<compile_context>
chip_gen: v7x
topology: tpu7x:2x2x1
jax: 0.10.0
libtpu: 0.0.40
codegen_flags: <defaults>
</compile_context>

<pallas_src>
import functools

import jax
import jax.numpy as jnp
from jax import lax
from jax.experimental import pallas as pl
from jax.experimental.pallas import tpu as pltpu

EPS = 1e-5


def _round_up(x, m):
    return ((x + m - 1) // m) * m


def _cdiv(a, b):
    return -(-a // b)


# --------------------------------- kernels -----------------------------------

def _front_kernel(x_ref, mask_ref, pos_ref, w_ref, b_ref, o_ref, aug_ref, *,
                  hw, tile, halo, w4, c, cp):
    """Fused instance-norm + PE + (QKV 1x1 composed into dilated 3x3) conv.

    x_ref/mask_ref/pos_ref are VMEM-resident flattened zero-padded images
    (row stride w4 = W + 4).  Each grid step produces `tile` flat output
    positions for all three branches stacked on rows (q|k|v).
    """
    i = pl.program_id(0)

    # ---- instance-norm statistics from the resident full image (pads masked) ----
    x_full = x_ref[...]                                   # (C, Lpad) f32
    m_full = mask_ref[...]                                # (1, Lpad)
    mean = jnp.sum(x_full, axis=1, keepdims=True) * (1.0 / hw)
    xc = (x_full - mean) * m_full
    var = jnp.sum(xc * xc, axis=1, keepdims=True) * (1.0 / hw)
    rstd = lax.rsqrt(var + EPS)

    # ---- normalize + positional encoding on this tile's (tile + halo) window ----
    win = tile + halo
    start = pl.multiple_of(i * tile, 128)
    xw = x_ref[:, pl.ds(start, win)]                      # (C, win)
    mw = mask_ref[:, pl.ds(start, win)]                   # (1, win)
    pw = pos_ref[:, pl.ds(start, win)]                    # (1, win)
    hm = (((xw - mean) * rstd) + pw) * mw                 # (C, win) f32, zero at pads

    pieces = [hm, mw]
    pad_rows = cp - (c + 1)
    if pad_rows > 0:
        pieces.append(jnp.zeros((pad_rows, win), jnp.float32))
    aug_ref[...] = jnp.concatenate(pieces, axis=0).astype(jnp.bfloat16)   # (cp, win)

    # ---- im2col over the 9 dilated taps -> one deep MXU dot ----
    cols = jnp.concatenate(
        [aug_ref[:, 2 * kh * w4 + 2 * kw: 2 * kh * w4 + 2 * kw + tile]
         for kh in range(3) for kw in range(3)],
        axis=0)                                           # (9*cp, tile) bf16
    acc = jnp.dot(w_ref[...], cols, preferred_element_type=jnp.float32)   # (3Cp, tile)
    o_ref[...] = (acc + b_ref[...]).astype(o_ref.dtype)


def _attn_proj_kernel(qkv_ref, x_ref, wp_ref, bp_ref, o_ref, *, c, accel, scale):
    """Blocked attention + proj_out + residual on the flattened (a, c) row layout.

    qkv_ref: (3*accel*C, TL) bf16, rows ordered (branch, block a, channel).
    x_ref  : (accel*C,  TL) f32 residual input; o_ref same shape, f32.
    """
    a_n = accel
    ac = a_n * c

    ks = [qkv_ref[ac + b * c: ac + (b + 1) * c, :].astype(jnp.float32)
          for b in range(a_n)]
    vs = [qkv_ref[2 * ac + b * c: 2 * ac + (b + 1) * c, :].astype(jnp.float32)
          for b in range(a_n)]

    # scores for all (a, b) pairs, packed (a-major) so exp/reciprocal run on >=8 sublanes
    rows = []
    for a in range(a_n):
        qa = qkv_ref[a * c:(a + 1) * c, :].astype(jnp.float32)
        sa = [jnp.sum(qa * ks[b], axis=0, keepdims=True) * scale for b in range(a_n)]
        m = sa[0]
        for b in range(1, a_n):
            m = jnp.maximum(m, sa[b])
        rows.extend([sa[b] - m for b in range(a_n)])
    e = jnp.exp(jnp.concatenate(rows, axis=0))                       # (A*A, TL) one packed exp
    denom = jnp.concatenate(
        [jnp.sum(e[a * a_n:(a + 1) * a_n], axis=0, keepdims=True) for a in range(a_n)],
        axis=0)                                                      # (A, TL)
    inv = pl.reciprocal(denom, approx=True)                          # (A, TL)

    wp = wp_ref[...]
    bp = bp_ref[...]
    for a in range(a_n):
        h = vs[0] * (e[a * a_n: a * a_n + 1, :] * inv[a:a + 1, :])
        for b in range(1, a_n):
            h = h + vs[b] * (e[a * a_n + b: a * a_n + b + 1, :] * inv[a:a + 1, :])
        out = jnp.dot(wp, h.astype(jnp.bfloat16), preferred_element_type=jnp.float32)
        o_ref[a * c:(a + 1) * c, :] = out + bp + x_ref[a * c:(a + 1) * c, :]


# ----------------------------- pallas_call wrappers ---------------------------

def fused_front(x_flat, mask_flat, pos_flat, w_big, b_big, *,
                hw, tile, halo, w4, c, cp, grid1):
    c3p = w_big.shape[0]
    lpad = x_flat.shape[1]
    kernel = functools.partial(_front_kernel, hw=hw, tile=tile, halo=halo,
                               w4=w4, c=c, cp=cp)
    return pl.pallas_call(
        kernel,
        out_shape=jax.ShapeDtypeStruct((c3p, grid1 * tile), jnp.bfloat16),
        grid=(grid1,),
        in_specs=[
            pl.BlockSpec((x_flat.shape[0], lpad), lambda i: (0, 0)),   # x (resident)
            pl.BlockSpec((1, lpad), lambda i: (0, 0)),                 # mask (resident)
            pl.BlockSpec((1, lpad), lambda i: (0, 0)),                 # pos (resident)
            pl.BlockSpec(w_big.shape, lambda i: (0, 0)),               # composed taps
            pl.BlockSpec(b_big.shape, lambda i: (0, 0)),               # dilated-conv bias
        ],
        out_specs=pl.BlockSpec((c3p, tile), lambda i: (0, i)),
        scratch_shapes=[pltpu.VMEM((cp, tile + halo), jnp.bfloat16)],
        compiler_params=pltpu.CompilerParams(dimension_semantics=("parallel",)),
    )(x_flat, mask_flat, pos_flat, w_big, b_big)


def fused_attn_proj(qkv_blk, x_blk, wp, bp, *, c, accel, scale, tl):
    rows_q = qkv_blk.shape[0]
    rows_o = x_blk.shape[0]
    lp = qkv_blk.shape[1]
    kernel = functools.partial(_attn_proj_kernel, c=c, accel=accel, scale=scale)
    return pl.pallas_call(
        kernel,
        out_shape=jax.ShapeDtypeStruct((rows_o, lp), jnp.float32),
        grid=(lp // tl,),
        in_specs=[
            pl.BlockSpec((rows_q, tl), lambda i: (0, i)),
            pl.BlockSpec((rows_o, tl), lambda i: (0, i)),
            pl.BlockSpec(wp.shape, lambda i: (0, 0)),
            pl.BlockSpec(bp.shape, lambda i: (0, 0)),
        ],
        out_specs=pl.BlockSpec((rows_o, tl), lambda i: (0, i)),
        compiler_params=pltpu.CompilerParams(dimension_semantics=("parallel",)),
    )(qkv_blk, x_blk, wp, bp)


# ------------------------------- glue / forward -------------------------------

def get_positional_encodings(seq_len, embed_dim):
    i = jnp.arange(embed_dim)
    freqs = 1.0 / (10000.0 ** (2.0 * (i // 2).astype(jnp.float32) / embed_dim))
    positions = jnp.arange(seq_len, dtype=jnp.float32)[:, None]
    scaled = positions * freqs[None, :]
    enc = jnp.concatenate([jnp.sin(scaled), jnp.cos(scaled)], axis=1)[:, :embed_dim]
    return enc  # (seq_len, embed_dim) == (H, W)


def attention_pe_forward(params, x, accel):
    # x: (1, C, H, W) float32 (NCHW, batch == 1 as the torch module assumes)
    _, C, H, W = x.shape
    HW = H * W
    W4 = W + 4
    Hp = H + 4
    cp = _round_up(C + 1, 8)            # im2col rows per tap (padded for alignment)

    # ---- pre-compose the q/k/v 1x1 convs into the 9 dilated-conv taps (weights only) ----
    taps = [(kh, kw) for kh in range(3) for kw in range(3)]

    def branch_weight(wt, bt):
        waug = jnp.concatenate([wt, bt], axis=1)                      # (C, C+1)
        waug = jnp.pad(waug, ((0, 0), (0, cp - (C + 1))))             # (C, cp)
        return jnp.concatenate(
            [params['wd'][:, :, kh, kw] @ waug for kh, kw in taps], axis=1)   # (C, 9*cp)

    w_big = jnp.concatenate([branch_weight(params['wq'], params['bq']),
                             branch_weight(params['wk'], params['bk']),
                             branch_weight(params['wv'], params['bv'])], axis=0)
    b_big = jnp.tile(params['bd'], (3, 1))                            # (3C, 1)
    c3p = _round_up(3 * C, 16)                                        # unmasked bf16 stores
    w_big = jnp.pad(w_big, ((0, c3p - 3 * C), (0, 0))).astype(jnp.bfloat16)
    b_big = jnp.pad(b_big, ((0, c3p - 3 * C), (0, 0)))

    # ---- flattened zero-padded image, validity mask and positional encoding ----
    l_out = H * W4
    halo = 4 * W4 + 4
    tile = max(128, _round_up(_cdiv(l_out, max(2, _cdiv(l_out, 512))), 128))
    grid1 = _cdiv(l_out, tile)
    lpad = _round_up(grid1 * tile + halo, 128)

    def pad_flat(img):  # (rows, H, W) -> (rows, lpad), 2-pixel zero border
        r = img.shape[0]
        p = jnp.pad(img, ((0, 0), (2, 2), (2, 2))).reshape(r, Hp * W4)
        return jnp.pad(p, ((0, 0), (0, lpad - Hp * W4)))

    x_img = x.reshape(C, H, W).astype(jnp.float32)
    x_flat = pad_flat(x_img)
    mask_flat = pad_flat(jnp.ones((1, H, W), jnp.float32))
    pos_flat = pad_flat(get_positional_encodings(H, W)[None])

    # ---- kernel 1: stats + norm + PE + QKV + dilated conv ----
    conv = fused_front(x_flat, mask_flat, pos_flat, w_big, b_big,
                       hw=float(HW), tile=tile, halo=halo, w4=W4, c=C, cp=cp,
                       grid1=grid1)
    conv = conv[:3 * C, :l_out].reshape(3 * C, H, W4)[:, :, :W]       # (3C, H, W) bf16

    # ---- block relayout (pure data movement; XLA glue) ----
    pad_total = (accel - (W - accel)) % accel
    pad_right = pad_total // 2
    pad_left = pad_total - pad_right
    convp = jnp.pad(conv, ((0, 0), (0, 0), (pad_left, pad_right)), mode='reflect')
    xp = jnp.pad(x_img, ((0, 0), (0, 0), (pad_left, pad_right)), mode='reflect')
    Wp_ = W + pad_total
    Wb = Wp_ // accel
    L = H * Wb
    qkv_blk = (convp.reshape(3, C, H, accel, Wb)
               .transpose(0, 3, 1, 2, 4)
               .reshape(3 * accel * C, L))
    x_blk = (xp.reshape(C, H, accel, Wb)
             .transpose(2, 0, 1, 3)
             .reshape(accel * C, L))

    if L >= 256:
        tl = max(128, _round_up(_cdiv(L, max(2, _cdiv(L, 512))), 128))
    else:
        tl = _round_up(L, 128)
    Lp = _round_up(L, tl)
    qkv_blk = jnp.pad(qkv_blk, ((0, 0), (0, Lp - L)))
    x_blk = jnp.pad(x_blk, ((0, 0), (0, Lp - L)))

    # ---- kernel 2: blocked attention + proj_out + residual ----
    out_blk = fused_attn_proj(qkv_blk, x_blk,
                              params['wp'].astype(jnp.bfloat16), params['bp'],
                              c=C, accel=accel, scale=float(C) ** (-0.5), tl=tl)

    out = (out_blk[:, :L].reshape(accel, C, H, Wb)
           .transpose(1, 2, 0, 3)
           .reshape(C, H, Wp_)[:, :, pad_left:Wp_ - pad_right])
    return out.reshape(1, C, H, W)


# ------------------------------ pure-JAX reference ----------------------------

def reshape_to_blocks(x, accel):
    _, C, H, W = x.shape
    pad_total = (accel - (W - accel)) % accel
    pad_right = pad_total // 2
    pad_left = pad_total - pad_right
    x = jnp.pad(x, ((0, 0), (0, 0), (0, 0), (pad_left, pad_right)), mode='reflect')
    Wp = x.shape[3]
    Wb = Wp // accel
    x = x.reshape(1, C, H, accel, Wb).transpose(0, 1, 2, 4, 3)
    x = x.reshape(C, H * Wb, accel).transpose(1, 0, 2)
    return x  # (L, C, accel)


def reshape_from_blocks(x, image_size, accel):
    C = x.shape[1]
    H, W = image_size
    x = x.transpose(1, 0, 2).reshape(1, C, H, -1, accel)
    x = x.transpose(0, 1, 2, 4, 3).reshape(1, C, H, -1)
    Wp = x.shape[3]
    pad_total = Wp - W
    pad_right = pad_total // 2
    pad_left = pad_total - pad_right
    return x[:, :, :, pad_left:Wp - pad_right]


def attention_pe_reference(params, x, accel):
    _, C, H, W = x.shape
    mean = x.mean(axis=(2, 3), keepdims=True)
    var = ((x - mean) ** 2).mean(axis=(2, 3), keepdims=True)
    h = (x - mean) / jnp.sqrt(var + EPS)
    h = h + get_positional_encodings(H, W)

    def conv1x1(w, b, t):
        return (jnp.einsum('oc,nchw->nohw', w, t, precision=lax.Precision.HIGHEST)
                + b.reshape(1, C, 1, 1))

    def dilated(t):
        out = lax.conv_general_dilated(
            t, params['wd'], window_strides=(1, 1), padding=((2, 2), (2, 2)),
            rhs_dilation=(2, 2), dimension_numbers=('NCHW', 'OIHW', 'NCHW'),
            precision=lax.Precision.HIGHEST)
        return out + params['bd'].reshape(1, C, 1, 1)

    q = dilated(conv1x1(params['wq'], params['bq'], h))
    k = dilated(conv1x1(params['wk'], params['bk'], h))
    v = dilated(conv1x1(params['wv'], params['bv'], h))

    qb = reshape_to_blocks(q, accel).transpose(0, 2, 1)      # (L, A, C)
    kb = reshape_to_blocks(k, accel)                         # (L, C, A)
    w_ = jnp.einsum('lac,lcb->lab', qb, kb,
                    precision=lax.Precision.HIGHEST) * (float(C) ** (-0.5))
    w_ = jax.nn.softmax(w_, axis=2)
    vb = reshape_to_blocks(v, accel)
    hb = jnp.einsum('lcb,lab->lca', vb, w_, precision=lax.Precision.HIGHEST)
    hh = reshape_from_blocks(hb, (H, W), accel)
    out = (jnp.einsum('oc,nchw->nohw', params['wp'], hh,
                      precision=lax.Precision.HIGHEST)
           + params['bp'].reshape(1, C, 1, 1))
    return x + out


# ----------------------------------- params -----------------------------------

def init_params(key, C):
    ks = jax.random.split(key, 10)

    def w(k, shape, scale=0.1):
        return scale * jax.random.normal(k, shape, dtype=jnp.float32)

    return {
        'wq': w(ks[0], (C, C)), 'bq': w(ks[1], (C, 1)),
        'wk': w(ks[2], (C, C)), 'bk': w(ks[3], (C, 1)),
        'wv': w(ks[4], (C, C)), 'bv': w(ks[5], (C, 1)),
        'wp': w(ks[6], (C, C)), 'bp': w(ks[7], (C, 1)),
        'wd': w(ks[8], (C, C, 3, 3)), 'bd': w(ks[9], (C, 1)),
    }


# ------------------------------------ main -------------------------------------

if __name__ == "__main__":
    key = jax.random.PRNGKey(0)
    C, H, W, accel = 8, 32, 32, 4
    pkey, xkey = jax.random.split(key)
    params = init_params(pkey, C)
    x = jax.random.normal(xkey, (1, C, H, W), dtype=jnp.float32)

    fwd = jax.jit(attention_pe_forward, static_argnames=('accel',))
    out = fwd(params, x, accel=accel)
    out = jax.block_until_ready(out)

    ref = attention_pe_reference(params, x, accel)
    assert out.shape == x.shape
    assert bool(jnp.all(jnp.isfinite(out))), "non-finite output"
    err = float(jnp.max(jnp.abs(out - ref)))
    # bf16 matmul operands / bf16 intermediate vs an f32 HIGHEST-precision reference.
    assert err < 5e-2, f"mismatch vs reference, max abs err = {err}"
    print("KERNEL_OK")
</pallas_src>

<mosaic_0001>
module attributes {stable_mosaic.version = 11 : i64} {
  func.func @_front_kernel(%arg0: i32, %arg1: memref<8x1408xf32, #tpu.memory_space<vmem>>, %arg2: memref<1x1408xf32, #tpu.memory_space<vmem>>, %arg3: memref<1x1408xf32, #tpu.memory_space<vmem>>, %arg4: memref<32x144xbf16, #tpu.memory_space<vmem>>, %arg5: memref<32x1xf32, #tpu.memory_space<vmem>>, %arg6: memref<32x384xbf16, #tpu.memory_space<vmem>>, %arg7: memref<16x532xbf16, #tpu.memory_space<vmem>>) attributes {dimension_semantics = [#tpu.dimension_semantics<parallel>], iteration_bounds = array<i64: 3>, scalar_prefetch = 0 : i64, scratch_operands = 1 : i64, tpu.core_type = #tpu.core_type<tc>, window_params = [{pipeline_mode = #tpu.pipeline_mode<synchronous>, transform_indices = @transform_0, window_bounds = array<i64: 8, 1408>}, {pipeline_mode = #tpu.pipeline_mode<synchronous>, transform_indices = @transform_1, window_bounds = array<i64: 1, 1408>}, {pipeline_mode = #tpu.pipeline_mode<synchronous>, transform_indices = @transform_2, window_bounds = array<i64: 1, 1408>}, {pipeline_mode = #tpu.pipeline_mode<synchronous>, transform_indices = @transform_3, window_bounds = array<i64: 32, 144>}, {pipeline_mode = #tpu.pipeline_mode<synchronous>, transform_indices = @transform_4, window_bounds = array<i64: 32, 1>}, {transform_indices = @transform_5, window_bounds = array<i64: 32, 384>}]} {
    %c0 = arith.constant 0 : index
    %c0_0 = arith.constant 0 : index
    %0 = vector.load %arg1[%c0, %c0_0] : memref<8x1408xf32, #tpu.memory_space<vmem>>, vector<8x1408xf32>
    %c0_1 = arith.constant 0 : index
    %c0_2 = arith.constant 0 : index
    %1 = vector.load %arg2[%c0_1, %c0_2] : memref<1x1408xf32, #tpu.memory_space<vmem>>, vector<1x1408xf32>
    %cst = arith.constant dense<0.000000e+00> : vector<8xf32>
    %2 = vector.multi_reduction <add>, %0, %cst [1] : vector<8x1408xf32> to vector<8xf32>
    %3 = vector.shape_cast %2 : vector<8xf32> to vector<8x1xf32>
    %cst_3 = arith.constant 9.765625E-4 : f32
    %4 = vector.broadcast %cst_3 : f32 to vector<8x1xf32>
    %5 = arith.mulf %3, %4 : vector<8x1xf32>
    %6 = vector.broadcast %5 : vector<8x1xf32> to vector<8x1408xf32>
    %7 = arith.subf %0, %6 : vector<8x1408xf32>
    %8 = vector.broadcast %1 : vector<1x1408xf32> to vector<8x1408xf32>
    %9 = arith.mulf %7, %8 : vector<8x1408xf32>
    %10 = arith.mulf %9, %9 : vector<8x1408xf32>
    %cst_4 = arith.constant dense<0.000000e+00> : vector<8xf32>
    %11 = vector.multi_reduction <add>, %10, %cst_4 [1] : vector<8x1408xf32> to vector<8xf32>
    %12 = vector.shape_cast %11 : vector<8xf32> to vector<8x1xf32>
    %cst_5 = arith.constant 9.765625E-4 : f32
    %13 = vector.broadcast %cst_5 : f32 to vector<8x1xf32>
    %14 = arith.mulf %12, %13 : vector<8x1xf32>
    %cst_6 = arith.constant 9.99999974E-6 : f32
    %15 = vector.broadcast %cst_6 : f32 to vector<8x1xf32>
    %16 = arith.addf %14, %15 : vector<8x1xf32>
    %17 = math.rsqrt %16 : vector<8x1xf32>
    %c384_i32 = arith.constant 384 : i32
    %18 = arith.muli %arg0, %c384_i32 : i32
    %19 = tpu.assume_multiple %18, 128 : i32
    %c0_7 = arith.constant 0 : index
    %20 = arith.index_cast %19 : i32 to index
    %21 = vector.load %arg1[%c0_7, %20] : memref<8x1408xf32, #tpu.memory_space<vmem>>, vector<8x532xf32>
    %c0_8 = arith.constant 0 : index
    %22 = arith.index_cast %19 : i32 to index
    %23 = vector.load %arg2[%c0_8, %22] : memref<1x1408xf32, #tpu.memory_space<vmem>>, vector<1x532xf32>
    %c0_9 = arith.constant 0 : index
    %24 = arith.index_cast %19 : i32 to index
    %25 = vector.load %arg3[%c0_9, %24] : memref<1x1408xf32, #tpu.memory_space<vmem>>, vector<1x532xf32>
    %26 = vector.broadcast %5 : vector<8x1xf32> to vector<8x532xf32>
    %27 = arith.subf %21, %26 : vector<8x532xf32>
    %28 = vector.broadcast %17 : vector<8x1xf32> to vector<8x532xf32>
    %29 = arith.mulf %27, %28 : vector<8x532xf32>
    %30 = vector.broadcast %25 : vector<1x532xf32> to vector<8x532xf32>
    %31 = arith.addf %29, %30 : vector<8x532xf32>
    %32 = vector.broadcast %23 : vector<1x532xf32> to vector<8x532xf32>
    %33 = arith.mulf %31, %32 : vector<8x532xf32>
    %cst_10 = arith.constant 0.000000e+00 : f32
    %34 = vector.broadcast %cst_10 : f32 to vector<7x532xf32>
    %35 = tpu.concatenate %33, %23, %34 in 0 : vector<8x532xf32>, vector<1x532xf32>, vector<7x532xf32> -> vector<16x532xf32>
    %36 = arith.truncf %35 : vector<16x532xf32> to vector<16x532xbf16>
    %c0_11 = arith.constant 0 : index
    %c0_12 = arith.constant 0 : index
    %37 = vector.load %arg7[%c0_11, %c0_12] : memref<16x532xbf16, #tpu.memory_space<vmem>>, vector<16x532xbf16>
    tpu.vector_store %arg7[%c0_11, %c0_12], %36 {strides = array<i32>} : memref<16x532xbf16, #tpu.memory_space<vmem>>, vector<16x532xbf16>,
    %c0_13 = arith.constant 0 : index
    %c0_14 = arith.constant 0 : index
    %38 = vector.load %arg7[%c0_13, %c0_14] : memref<16x532xbf16, #tpu.memory_space<vmem>>, vector<16x384xbf16>
    %c0_15 = arith.constant 0 : index
    %c2 = arith.constant 2 : index
    %39 = vector.load %arg7[%c0_15, %c2] : memref<16x532xbf16, #tpu.memory_space<vmem>>, vector<16x384xbf16>
    %c0_16 = arith.constant 0 : index
    %c4 = arith.constant 4 : index
    %40 = vector.load %arg7[%c0_16, %c4] : memref<16x532xbf16, #tpu.memory_space<vmem>>, vector<16x384xbf16>
    %c0_17 = arith.constant 0 : index
    %c72 = arith.constant 72 : index
    %41 = vector.load %arg7[%c0_17, %c72] : memref<16x532xbf16, #tpu.memory_space<vmem>>, vector<16x384xbf16>
    %c0_18 = arith.constant 0 : index
    %c74 = arith.constant 74 : index
    %42 = vector.load %arg7[%c0_18, %c74] : memref<16x532xbf16, #tpu.memory_space<vmem>>, vector<16x384xbf16>
    %c0_19 = arith.constant 0 : index
    %c76 = arith.constant 76 : index
    %43 = vector.load %arg7[%c0_19, %c76] : memref<16x532xbf16, #tpu.memory_space<vmem>>, vector<16x384xbf16>
    %c0_20 = arith.constant 0 : index
    %c144 = arith.constant 144 : index
    %44 = vector.load %arg7[%c0_20, %c144] : memref<16x532xbf16, #tpu.memory_space<vmem>>, vector<16x384xbf16>
    %c0_21 = arith.constant 0 : index
    %c146 = arith.constant 146 : index
    %45 = vector.load %arg7[%c0_21, %c146] : memref<16x532xbf16, #tpu.memory_space<vmem>>, vector<16x384xbf16>
    %c0_22 = arith.constant 0 : index
    %c148 = arith.constant 148 : index
    %46 = vector.load %arg7[%c0_22, %c148] : memref<16x532xbf16, #tpu.memory_space<vmem>>, vector<16x384xbf16>
    %47 = tpu.concatenate %38, %39, %40, %41, %42, %43, %44, %45, %46 in 0 : vector<16x384xbf16>, vector<16x384xbf16>, vector<16x384xbf16>, vector<16x384xbf16>, vector<16x384xbf16>, vector<16x384xbf16>, vector<16x384xbf16>, vector<16x384xbf16>, vector<16x384xbf16> -> vector<144x384xbf16>
    %c0_23 = arith.constant 0 : index
    %c0_24 = arith.constant 0 : index
    %48 = vector.load %arg4[%c0_23, %c0_24] : memref<32x144xbf16, #tpu.memory_space<vmem>>, vector<32x144xbf16>
    %cst_25 = arith.constant dense<0.000000e+00> : vector<32x384xf32>
    %49 = tpu.matmul %48, %47, %cst_25 {dimension_numbers = #tpu.dot_dimension_numbers<[1], [0], [0], [1], [0, 0, 1, 1], [], []>} : vector<32x144xbf16>, vector<144x384xbf16>, vector<32x384xf32> -> vector<32x384xf32>
    %c0_26 = arith.constant 0 : index
    %c0_27 = arith.constant 0 : index
    %50 = vector.load %arg5[%c0_26, %c0_27] : memref<32x1xf32, #tpu.memory_space<vmem>>, vector<32x1xf32>
    %51 = vector.broadcast %50 : vector<32x1xf32> to vector<32x384xf32>
    %52 = arith.addf %49, %51 : vector<32x384xf32>
    %53 = arith.truncf %52 : vector<32x384xf32> to vector<32x384xbf16>
    %c0_28 = arith.constant 0 : index
    %c0_29 = arith.constant 0 : index
    %54 = vector.load %arg6[%c0_28, %c0_29] : memref<32x384xbf16, #tpu.memory_space<vmem>>, vector<32x384xbf16>
    tpu.vector_store %arg6[%c0_28, %c0_29], %53 {strides = array<i32>} : memref<32x384xbf16, #tpu.memory_space<vmem>>, vector<32x384xbf16>,
    return
  }
  func.func @transform_0(%arg0: i32) -> (i32, i32) {
    %c0_i32 = arith.constant 0 : i32
    %c0_i32_0 = arith.constant 0 : i32
    %c0_i32_1 = arith.constant 0 : i32
    return %c0_i32, %c0_i32_0 : i32, i32
  }
  func.func @transform_1(%arg0: i32) -> (i32, i32) {
    %c0_i32 = arith.constant 0 : i32
    %c0_i32_0 = arith.constant 0 : i32
    %c0_i32_1 = arith.constant 0 : i32
    return %c0_i32, %c0_i32_0 : i32, i32
  }
  func.func @transform_2(%arg0: i32) -> (i32, i32) {
    %c0_i32 = arith.constant 0 : i32
    %c0_i32_0 = arith.constant 0 : i32
    %c0_i32_1 = arith.constant 0 : i32
    return %c0_i32, %c0_i32_0 : i32, i32
  }
  func.func @transform_3(%arg0: i32) -> (i32, i32) {
    %c0_i32 = arith.constant 0 : i32
    %c0_i32_0 = arith.constant 0 : i32
    %c0_i32_1 = arith.constant 0 : i32
    return %c0_i32, %c0_i32_0 : i32, i32
  }
  func.func @transform_4(%arg0: i32) -> (i32, i32) {
    %c0_i32 = arith.constant 0 : i32
    %c0_i32_0 = arith.constant 0 : i32
    %c0_i32_1 = arith.constant 0 : i32
    return %c0_i32, %c0_i32_0 : i32, i32
  }
  func.func @transform_5(%arg0: i32) -> (i32, i32) {
    %c0_i32 = arith.constant 0 : i32
    %c0_i32_0 = arith.constant 0 : i32
    return %c0_i32, %arg0 : i32, i32
  }
}

module attributes {stable_mosaic.version = 11 : i64} {
  func.func @_attn_proj_kernel(%arg0: i32, %arg1: memref<96x128xbf16, #tpu.memory_space<vmem>>, %arg2: memref<32x128xf32, #tpu.memory_space<vmem>>, %arg3: memref<8x8xbf16, #tpu.memory_space<vmem>>, %arg4: memref<8x1xf32, #tpu.memory_space<vmem>>, %arg5: memref<32x128xf32, #tpu.memory_space<vmem>>) attributes {dimension_semantics = [#tpu.dimension_semantics<parallel>], iteration_bounds = array<i64: 2>, scalar_prefetch = 0 : i64, scratch_operands = 0 : i64, tpu.core_type = #tpu.core_type<tc>, window_params = [{transform_indices = @transform_0, window_bounds = array<i64: 96, 128>}, {transform_indices = @transform_1, window_bounds = array<i64: 32, 128>}, {pipeline_mode = #tpu.pipeline_mode<synchronous>, transform_indices = @transform_2, window_bounds = array<i64: 8, 8>}, {pipeline_mode = #tpu.pipeline_mode<synchronous>, transform_indices = @transform_3, window_bounds = array<i64: 8, 1>}, {transform_indices = @transform_4, window_bounds = array<i64: 32, 128>}]} {
    %c32 = arith.constant 32 : index
    %c0 = arith.constant 0 : index
    %0 = vector.load %arg1[%c32, %c0] : memref<96x128xbf16, #tpu.memory_space<vmem>>, vector<8x128xbf16>
    %1 = arith.extf %0 : vector<8x128xbf16> to vector<8x128xf32>
    %c40 = arith.constant 40 : index
    %c0_0 = arith.constant 0 : index
    %2 = vector.load %arg1[%c40, %c0_0] : memref<96x128xbf16, #tpu.memory_space<vmem>>, vector<8x128xbf16>
    %3 = arith.extf %2 : vector<8x128xbf16> to vector<8x128xf32>
    %c48 = arith.constant 48 : index
    %c0_1 = arith.constant 0 : index
    %4 = vector.load %arg1[%c48, %c0_1] : memref<96x128xbf16, #tpu.memory_space<vmem>>, vector<8x128xbf16>
    %5 = arith.extf %4 : vector<8x128xbf16> to vector<8x128xf32>
    %c56 = arith.constant 56 : index
    %c0_2 = arith.constant 0 : index
    %6 = vector.load %arg1[%c56, %c0_2] : memref<96x128xbf16, #tpu.memory_space<vmem>>, vector<8x128xbf16>
    %7 = arith.extf %6 : vector<8x128xbf16> to vector<8x128xf32>
    %c64 = arith.constant 64 : index
    %c0_3 = arith.constant 0 : index
    %8 = vector.load %arg1[%c64, %c0_3] : memref<96x128xbf16, #tpu.memory_space<vmem>>, vector<8x128xbf16>
    %9 = arith.extf %8 : vector<8x128xbf16> to vector<8x128xf32>
    %c72 = arith.constant 72 : index
    %c0_4 = arith.constant 0 : index
    %10 = vector.load %arg1[%c72, %c0_4] : memref<96x128xbf16, #tpu.memory_space<vmem>>, vector<8x128xbf16>
    %11 = arith.extf %10 : vector<8x128xbf16> to vector<8x128xf32>
    %c80 = arith.constant 80 : index
    %c0_5 = arith.constant 0 : index
    %12 = vector.load %arg1[%c80, %c0_5] : memref<96x128xbf16, #tpu.memory_space<vmem>>, vector<8x128xbf16>
    %13 = arith.extf %12 : vector<8x128xbf16> to vector<8x128xf32>
    %c88 = arith.constant 88 : index
    %c0_6 = arith.constant 0 : index
    %14 = vector.load %arg1[%c88, %c0_6] : memref<96x128xbf16, #tpu.memory_space<vmem>>, vector<8x128xbf16>
    %15 = arith.extf %14 : vector<8x128xbf16> to vector<8x128xf32>
    %c0_7 = arith.constant 0 : index
    %c0_8 = arith.constant 0 : index
    %16 = vector.load %arg1[%c0_7, %c0_8] : memref<96x128xbf16, #tpu.memory_space<vmem>>, vector<8x128xbf16>
    %17 = arith.extf %16 : vector<8x128xbf16> to vector<8x128xf32>
    %18 = arith.mulf %17, %1 : vector<8x128xf32>
    %cst = arith.constant dense<0.000000e+00> : vector<128xf32>
    %19 = vector.multi_reduction <add>, %18, %cst [0] : vector<8x128xf32> to vector<128xf32>
    %20 = vector.shape_cast %19 : vector<128xf32> to vector<1x128xf32>
    %cst_9 = arith.constant 0.353553385 : f32
    %21 = vector.broadcast %cst_9 : f32 to vector<1x128xf32>
    %22 = arith.mulf %20, %21 : vector<1x128xf32>
    %23 = arith.mulf %17, %3 : vector<8x128xf32>
    %cst_10 = arith.constant dense<0.000000e+00> : vector<128xf32>
    %24 = vector.multi_reduction <add>, %23, %cst_10 [0] : vector<8x128xf32> to vector<128xf32>
    %25 = vector.shape_cast %24 : vector<128xf32> to vector<1x128xf32>
    %cst_11 = arith.constant 0.353553385 : f32
    %26 = vector.broadcast %cst_11 : f32 to vector<1x128xf32>
    %27 = arith.mulf %25, %26 : vector<1x128xf32>
    %28 = arith.mulf %17, %5 : vector<8x128xf32>
    %cst_12 = arith.constant dense<0.000000e+00> : vector<128xf32>
    %29 = vector.multi_reduction <add>, %28, %cst_12 [0] : vector<8x128xf32> to vector<128xf32>
    %30 = vector.shape_cast %29 : vector<128xf32> to vector<1x128xf32>
    %cst_13 = arith.constant 0.353553385 : f32
    %31 = vector.broadcast %cst_13 : f32 to vector<1x128xf32>
    %32 = arith.mulf %30, %31 : vector<1x128xf32>
    %33 = arith.mulf %17, %7 : vector<8x128xf32>
    %cst_14 = arith.constant dense<0.000000e+00> : vector<128xf32>
    %34 = vector.multi_reduction <add>, %33, %cst_14 [0] : vector<8x128xf32> to vector<128xf32>
    %35 = vector.shape_cast %34 : vector<128xf32> to vector<1x128xf32>
    %cst_15 = arith.constant 0.353553385 : f32
    %36 = vector.broadcast %cst_15 : f32 to vector<1x128xf32>
    %37 = arith.mulf %35, %36 : vector<1x128xf32>
    %38 = arith.maximumf %22, %27 : vector<1x128xf32>
    %39 = arith.maximumf %38, %32 : vector<1x128xf32>
    %40 = arith.maximumf %39, %37 : vector<1x128xf32>
    %41 = arith.subf %22, %40 : vector<1x128xf32>
    %42 = arith.subf %27, %40 : vector<1x128xf32>
    %43 = arith.subf %32, %40 : vector<1x128xf32>
    %44 = arith.subf %37, %40 : vector<1x128xf32>
    %c8 = arith.constant 8 : index
    %c0_16 = arith.constant 0 : index
    %45 = vector.load %arg1[%c8, %c0_16] : memref<96x128xbf16, #tpu.memory_space<vmem>>, vector<8x128xbf16>
    %46 = arith.extf %45 : vector<8x128xbf16> to vector<8x128xf32>
    %47 = arith.mulf %46, %1 : vector<8x128xf32>
    %cst_17 = arith.constant dense<0.000000e+00> : vector<128xf32>
    %48 = vector.multi_reduction <add>, %47, %cst_17 [0] : vector<8x128xf32> to vector<128xf32>
    %49 = vector.shape_cast %48 : vector<128xf32> to vector<1x128xf32>
    %cst_18 = arith.constant 0.353553385 : f32
    %50 = vector.broadcast %cst_18 : f32 to vector<1x128xf32>
    %51 = arith.mulf %49, %50 : vector<1x128xf32>
    %52 = arith.mulf %46, %3 : vector<8x128xf32>
    %cst_19 = arith.constant dense<0.000000e+00> : vector<128xf32>
    %53 = vector.multi_reduction <add>, %52, %cst_19 [0] : vector<8x128xf32> to vector<128xf32>
    %54 = vector.shape_cast %53 : vector<128xf32> to vector<1x128xf32>
    %cst_20 = arith.constant 0.353553385 : f32
    %55 = vector.broadcast %cst_20 : f32 to vector<1x128xf32>
    %56 = arith.mulf %54, %55 : vector<1x128xf32>
    %57 = arith.mulf %46, %5 : vector<8x128xf32>
    %cst_21 = arith.constant dense<0.000000e+00> : vector<128xf32>
    %58 = vector.multi_reduction <add>, %57, %cst_21 [0] : vector<8x128xf32> to vector<128xf32>
    %59 = vector.shape_cast %58 : vector<128xf32> to vector<1x128xf32>
    %cst_22 = arith.constant 0.353553385 : f32
    %60 = vector.broadcast %cst_22 : f32 to vector<1x128xf32>
    %61 = arith.mulf %59, %60 : vector<1x128xf32>
    %62 = arith.mulf %46, %7 : vector<8x128xf32>
    %cst_23 = arith.constant dense<0.000000e+00> : vector<128xf32>
    %63 = vector.multi_reduction <add>, %62, %cst_23 [0] : vector<8x128xf32> to vector<128xf32>
    %64 = vector.shape_cast %63 : vector<128xf32> to vector<1x128xf32>
    %cst_24 = arith.constant 0.353553385 : f32
    %65 = vector.broadcast %cst_24 : f32 to vector<1x128xf32>
    %66 = arith.mulf %64, %65 : vector<1x128xf32>
    %67 = arith.maximumf %51, %56 : vector<1x128xf32>
    %68 = arith.maximumf %67, %61 : vector<1x128xf32>
    %69 = arith.maximumf %68, %66 : vector<1x128xf32>
    %70 = arith.subf %51, %69 : vector<1x128xf32>
    %71 = arith.subf %56, %69 : vector<1x128xf32>
    %72 = arith.subf %61, %69 : vector<1x128xf32>
    %73 = arith.subf %66, %69 : vector<1x128xf32>
    %c16 = arith.constant 16 : index
    %c0_25 = arith.constant 0 : index
    %74 = vector.load %arg1[%c16, %c0_25] : memref<96x128xbf16, #tpu.memory_space<vmem>>, vector<8x128xbf16>
    %75 = arith.extf %74 : vector<8x128xbf16> to vector<8x128xf32>
    %76 = arith.mulf %75, %1 : vector<8x128xf32>
    %cst_26 = arith.constant dense<0.000000e+00> : vector<128xf32>
    %77 = vector.multi_reduction <add>, %76, %cst_26 [0] : vector<8x128xf32> to vector<128xf32>
    %78 = vector.shape_cast %77 : vector<128xf32> to vector<1x128xf32>
    %cst_27 = arith.constant 0.353553385 : f32
    %79 = vector.broadcast %cst_27 : f32 to vector<1x128xf32>
    %80 = arith.mulf %78, %79 : vector<1x128xf32>
    %81 = arith.mulf %75, %3 : vector<8x128xf32>
    %cst_28 = arith.constant dense<0.000000e+00> : vector<128xf32>
    %82 = vector.multi_reduction <add>, %81, %cst_28 [0] : vector<8x128xf32> to vector<128xf32>
    %83 = vector.shape_cast %82 : vector<128xf32> to vector<1x128xf32>
    %cst_29 = arith.constant 0.353553385 : f32
    %84 = vector.broadcast %cst_29 : f32 to vector<1x128xf32>
    %85 = arith.mulf %83, %84 : vector<1x128xf32>
    %86 = arith.mulf %75, %5 : vector<8x128xf32>
    %cst_30 = arith.constant dense<0.000000e+00> : vector<128xf32>
    %87 = vector.multi_reduction <add>, %86, %cst_30 [0] : vector<8x128xf32> to vector<128xf32>
    %88 = vector.shape_cast %87 : vector<128xf32> to vector<1x128xf32>
    %cst_31 = arith.constant 0.353553385 : f32
    %89 = vector.broadcast %cst_31 : f32 to vector<1x128xf32>
    %90 = arith.mulf %88, %89 : vector<1x128xf32>
    %91 = arith.mulf %75, %7 : vector<8x128xf32>
    %cst_32 = arith.constant dense<0.000000e+00> : vector<128xf32>
    %92 = vector.multi_reduction <add>, %91, %cst_32 [0] : vector<8x128xf32> to vector<128xf32>
    %93 = vector.shape_cast %92 : vector<128xf32> to vector<1x128xf32>
    %cst_33 = arith.constant 0.353553385 : f32
    %94 = vector.broadcast %cst_33 : f32 to vector<1x128xf32>
    %95 = arith.mulf %93, %94 : vector<1x128xf32>
    %96 = arith.maximumf %80, %85 : vector<1x128xf32>
    %97 = arith.maximumf %96, %90 : vector<1x128xf32>
    %98 = arith.maximumf %97, %95 : vector<1x128xf32>
    %99 = arith.subf %80, %98 : vector<1x128xf32>
    %100 = arith.subf %85, %98 : vector<1x128xf32>
    %101 = arith.subf %90, %98 : vector<1x128xf32>
    %102 = arith.subf %95, %98 : vector<1x128xf32>
    %c24 = arith.constant 24 : index
    %c0_34 = arith.constant 0 : index
    %103 = vector.load %arg1[%c24, %c0_34] : memref<96x128xbf16, #tpu.memory_space<vmem>>, vector<8x128xbf16>
    %104 = arith.extf %103 : vector<8x128xbf16> to vector<8x128xf32>
    %105 = arith.mulf %104, %1 : vector<8x128xf32>
    %cst_35 = arith.constant dense<0.000000e+00> : vector<128xf32>
    %106 = vector.multi_reduction <add>, %105, %cst_35 [0] : vector<8x128xf32> to vector<128xf32>
    %107 = vector.shape_cast %106 : vector<128xf32> to vector<1x128xf32>
    %cst_36 = arith.constant 0.353553385 : f32
    %108 = vector.broadcast %cst_36 : f32 to vector<1x128xf32>
    %109 = arith.mulf %107, %108 : vector<1x128xf32>
    %110 = arith.mulf %104, %3 : vector<8x128xf32>
    %cst_37 = arith.constant dense<0.000000e+00> : vector<128xf32>
    %111 = vector.multi_reduction <add>, %110, %cst_37 [0] : vector<8x128xf32> to vector<128xf32>
    %112 = vector.shape_cast %111 : vector<128xf32> to vector<1x128xf32>
    %cst_38 = arith.constant 0.353553385 : f32
    %113 = vector.broadcast %cst_38 : f32 to vector<1x128xf32>
    %114 = arith.mulf %112, %113 : vector<1x128xf32>
    %115 = arith.mulf %104, %5 : vector<8x128xf32>
    %cst_39 = arith.constant dense<0.000000e+00> : vector<128xf32>
    %116 = vector.multi_reduction <add>, %115, %cst_39 [0] : vector<8x128xf32> to vector<128xf32>
    %117 = vector.shape_cast %116 : vector<128xf32> to vector<1x128xf32>
    %cst_40 = arith.constant 0.353553385 : f32
    %118 = vector.broadcast %cst_40 : f32 to vector<1x128xf32>
    %119 = arith.mulf %117, %118 : vector<1x128xf32>
    %120 = arith.mulf %104, %7 : vector<8x128xf32>
    %cst_41 = arith.constant dense<0.000000e+00> : vector<128xf32>
    %121 = vector.multi_reduction <add>, %120, %cst_41 [0] : vector<8x128xf32> to vector<128xf32>
    %122 = vector.shape_cast %121 : vector<128xf32> to vector<1x128xf32>
    %cst_42 = arith.constant 0.353553385 : f32
    %123 = vector.broadcast %cst_42 : f32 to vector<1x128xf32>
    %124 = arith.mulf %122, %123 : vector<1x128xf32>
    %125 = arith.maximumf %109, %114 : vector<1x128xf32>
    %126 = arith.maximumf %125, %119 : vector<1x128xf32>
    %127 = arith.maximumf %126, %124 : vector<1x128xf32>
    %128 = arith.subf %109, %127 : vector<1x128xf32>
    %129 = arith.subf %114, %127 : vector<1x128xf32>
    %130 = arith.subf %119, %127 : vector<1x128xf32>
    %131 = arith.subf %124, %127 : vector<1x128xf32>
    %132 = tpu.concatenate %41, %42, %43, %44, %70, %71, %72, %73, %99, %100, %101, %102, %128, %129, %130, %131 in 0 : vector<1x128xf32>, vector<1x128xf32>, vector<1x128xf32>, vector<1x128xf32>, vector<1x128xf32>, vector<1x128xf32>, vector<1x128xf32>, vector<1x128xf32>, vector<1x128xf32>, vector<1x128xf32>, vector<1x128xf32>, vector<1x128xf32>, vector<1x128xf32>, vector<1x128xf32>, vector<1x128xf32>, vector<1x128xf32> -> vector<16x128xf32>
    %133 = math.exp %132 : vector<16x128xf32>
    %134 = vector.extract_strided_slice %133 {offsets = [0, 0], sizes = [4, 128], strides = [1, 1]} : vector<16x128xf32> to vector<4x128xf32>
    %cst_43 = arith.constant dense<0.000000e+00> : vector<128xf32>
    %135 = vector.multi_reduction <add>, %134, %cst_43 [0] : vector<4x128xf32> to vector<128xf32>
    %136 = vector.shape_cast %135 : vector<128xf32> to vector<1x128xf32>
    %137 = vector.extract_strided_slice %133 {offsets = [4, 0], sizes = [4, 128], strides = [1, 1]} : vector<16x128xf32> to vector<4x128xf32>
    %cst_44 = arith.constant dense<0.000000e+00> : vector<128xf32>
    %138 = vector.multi_reduction <add>, %137, %cst_44 [0] : vector<4x128xf32> to vector<128xf32>
    %139 = vector.shape_cast %138 : vector<128xf32> to vector<1x128xf32>
    %140 = vector.extract_strided_slice %133 {offsets = [8, 0], sizes = [4, 128], strides = [1, 1]} : vector<16x128xf32> to vector<4x128xf32>
    %cst_45 = arith.constant dense<0.000000e+00> : vector<128xf32>
    %141 = vector.multi_reduction <add>, %140, %cst_45 [0] : vector<4x128xf32> to vector<128xf32>
    %142 = vector.shape_cast %141 : vector<128xf32> to vector<1x128xf32>
    %143 = vector.extract_strided_slice %133 {offsets = [12, 0], sizes = [4, 128], strides = [1, 1]} : vector<16x128xf32> to vector<4x128xf32>
    %cst_46 = arith.constant dense<0.000000e+00> : vector<128xf32>
    %144 = vector.multi_reduction <add>, %143, %cst_46 [0] : vector<4x128xf32> to vector<128xf32>
    %145 = vector.shape_cast %144 : vector<128xf32> to vector<1x128xf32>
    %146 = tpu.concatenate %136, %139, %142, %145 in 0 : vector<1x128xf32>, vector<1x128xf32>, vector<1x128xf32>, vector<1x128xf32> -> vector<4x128xf32>
    %147 = tpu.reciprocal %146 {approx = true} : vector<4x128xf32> -> vector<4x128xf32>
    %c0_47 = arith.constant 0 : index
    %c0_48 = arith.constant 0 : index
    %148 = vector.load %arg3[%c0_47, %c0_48] : memref<8x8xbf16, #tpu.memory_space<vmem>>, vector<8x8xbf16>
    %c0_49 = arith.constant 0 : index
    %c0_50 = arith.constant 0 : index
    %149 = vector.load %arg4[%c0_49, %c0_50] : memref<8x1xf32, #tpu.memory_space<vmem>>, vector<8x1xf32>
    %150 = vector.extract_strided_slice %133 {offsets = [0, 0], sizes = [1, 128], strides = [1, 1]} : vector<16x128xf32> to vector<1x128xf32>
    %151 = vector.extract_strided_slice %147 {offsets = [0, 0], sizes = [1, 128], strides = [1, 1]} : vector<4x128xf32> to vector<1x128xf32>
    %152 = arith.mulf %150, %151 : vector<1x128xf32>
    %153 = vector.broadcast %152 : vector<1x128xf32> to vector<8x128xf32>
    %154 = arith.mulf %9, %153 : vector<8x128xf32>
    %155 = vector.extract_strided_slice %133 {offsets = [1, 0], sizes = [1, 128], strides = [1, 1]} : vector<16x128xf32> to vector<1x128xf32>
    %156 = vector.extract_strided_slice %147 {offsets = [0, 0], sizes = [1, 128], strides = [1, 1]} : vector<4x128xf32> to vector<1x128xf32>
    %157 = arith.mulf %155, %156 : vector<1x128xf32>
    %158 = vector.broadcast %157 : vector<1x128xf32> to vector<8x128xf32>
    %159 = arith.mulf %11, %158 : vector<8x128xf32>
    %160 = arith.addf %154, %159 : vector<8x128xf32>
    %161 = vector.extract_strided_slice %133 {offsets = [2, 0], sizes = [1, 128], strides = [1, 1]} : vector<16x128xf32> to vector<1x128xf32>
    %162 = vector.extract_strided_slice %147 {offsets = [0, 0], sizes = [1, 128], strides = [1, 1]} : vector<4x128xf32> to vector<1x128xf32>
    %163 = arith.mulf %161, %162 : vector<1x128xf32>
    %164 = vector.broadcast %163 : vector<1x128xf32> to vector<8x128xf32>
    %165 = arith.mulf %13, %164 : vector<8x128xf32>
    %166 = arith.addf %160, %165 : vector<8x128xf32>
    %167 = vector.extract_strided_slice %133 {offsets = [3, 0], sizes = [1, 128], strides = [1, 1]} : vector<16x128xf32> to vector<1x128xf32>
    %168 = vector.extract_strided_slice %147 {offsets = [0, 0], sizes = [1, 128], strides = [1, 1]} : vector<4x128xf32> to vector<1x128xf32>
    %169 = arith.mulf %167, %168 : vector<1x128xf32>
    %170 = vector.broadcast %169 : vector<1x128xf32> to vector<8x128xf32>
    %171 = arith.mulf %15, %170 : vector<8x128xf32>
    %172 = arith.addf %166, %171 : vector<8x128xf32>
    %173 = arith.truncf %172 : vector<8x128xf32> to vector<8x128xbf16>
    %cst_51 = arith.constant dense<0.000000e+00> : vector<8x128xf32>
    %174 = tpu.matmul %148, %173, %cst_51 {dimension_numbers = #tpu.dot_dimension_numbers<[1], [0], [0], [1], [0, 0, 1, 1], [], []>} : vector<8x8xbf16>, vector<8x128xbf16>, vector<8x128xf32> -> vector<8x128xf32>
    %175 = vector.broadcast %149 : vector<8x1xf32> to vector<8x128xf32>
    %176 = arith.addf %174, %175 : vector<8x128xf32>
    %c0_52 = arith.constant 0 : index
    %c0_53 = arith.constant 0 : index
    %177 = vector.load %arg2[%c0_52, %c0_53] : memref<32x128xf32, #tpu.memory_space<vmem>>, vector<8x128xf32>
    %178 = arith.addf %176, %177 : vector<8x128xf32>
    %c0_54 = arith.constant 0 : index
    %c0_55 = arith.constant 0 : index
    %179 = vector.load %arg5[%c0_54, %c0_55] : memref<32x128xf32, #tpu.memory_space<vmem>>, vector<8x128xf32>
    tpu.vector_store %arg5[%c0_54, %c0_55], %178 {strides = array<i32>} : memref<32x128xf32, #tpu.memory_space<vmem>>, vector<8x128xf32>,
    %180 = vector.extract_strided_slice %133 {offsets = [4, 0], sizes = [1, 128], strides = [1, 1]} : vector<16x128xf32> to vector<1x128xf32>
    %181 = vector.extract_strided_slice %147 {offsets = [1, 0], sizes = [1, 128], strides = [1, 1]} : vector<4x128xf32> to vector<1x128xf32>
    %182 = arith.mulf %180, %181 : vector<1x128xf32>
    %183 = vector.broadcast %182 : vector<1x128xf32> to vector<8x128xf32>
    %184 = arith.mulf %9, %183 : vector<8x128xf32>
    %185 = vector.extract_strided_slice %133 {offsets = [5, 0], sizes = [1, 128], strides = [1, 1]} : vector<16x128xf32> to vector<1x128xf32>
    %186 = vector.extract_strided_slice %147 {offsets = [1, 0], sizes = [1, 128], strides = [1, 1]} : vector<4x128xf32> to vector<1x128xf32>
    %187 = arith.mulf %185, %186 : vector<1x128xf32>
    %188 = vector.broadcast %187 : vector<1x128xf32> to vector<8x128xf32>
    %189 = arith.mulf %11, %188 : vector<8x128xf32>
    %190 = arith.addf %184, %189 : vector<8x128xf32>
    %191 = vector.extract_strided_slice %133 {offsets = [6, 0], sizes = [1, 128], strides = [1, 1]} : vector<16x128xf32> to vector<1x128xf32>
    %192 = vector.extract_strided_slice %147 {offsets = [1, 0], sizes = [1, 128], strides = [1, 1]} : vector<4x128xf32> to vector<1x128xf32>
    %193 = arith.mulf %191, %192 : vector<1x128xf32>
    %194 = vector.broadcast %193 : vector<1x128xf32> to vector<8x128xf32>
    %195 = arith.mulf %13, %194 : vector<8x128xf32>
    %196 = arith.addf %190, %195 : vector<8x128xf32>
    %197 = vector.extract_strided_slice %133 {offsets = [7, 0], sizes = [1, 128], strides = [1, 1]} : vector<16x128xf32> to vector<1x128xf32>
    %198 = vector.extract_strided_slice %147 {offsets = [1, 0], sizes = [1, 128], strides = [1, 1]} : vector<4x128xf32> to vector<1x128xf32>
    %199 = arith.mulf %197, %198 : vector<1x128xf32>
    %200 = vector.broadcast %199 : vector<1x128xf32> to vector<8x128xf32>
    %201 = arith.mulf %15, %200 : vector<8x128xf32>
    %202 = arith.addf %196, %201 : vector<8x128xf32>
    %203 = arith.truncf %202 : vector<8x128xf32> to vector<8x128xbf16>
    %cst_56 = arith.constant dense<0.000000e+00> : vector<8x128xf32>
    %204 = tpu.matmul %148, %203, %cst_56 {dimension_numbers = #tpu.dot_dimension_numbers<[1], [0], [0], [1], [0, 0, 1, 1], [], []>} : vector<8x8xbf16>, vector<8x128xbf16>, vector<8x128xf32> -> vector<8x128xf32>
    %205 = vector.broadcast %149 : vector<8x1xf32> to vector<8x128xf32>
    %206 = arith.addf %204, %205 : vector<8x128xf32>
    %c8_57 = arith.constant 8 : index
    %c0_58 = arith.constant 0 : index
    %207 = vector.load %arg2[%c8_57, %c0_58] : memref<32x128xf32, #tpu.memory_space<vmem>>, vector<8x128xf32>
    %208 = arith.addf %206, %207 : vector<8x128xf32>
    %c8_59 = arith.constant 8 : index
    %c0_60 = arith.constant 0 : index
    %209 = vector.load %arg5[%c8_59, %c0_60] : memref<32x128xf32, #tpu.memory_space<vmem>>, vector<8x128xf32>
    tpu.vector_store %arg5[%c8_59, %c0_60], %208 {strides = array<i32>} : memref<32x128xf32, #tpu.memory_space<vmem>>, vector<8x128xf32>,
    %210 = vector.extract_strided_slice %133 {offsets = [8, 0], sizes = [1, 128], strides = [1, 1]} : vector<16x128xf32> to vector<1x128xf32>
    %211 = vector.extract_strided_slice %147 {offsets = [2, 0], sizes = [1, 128], strides = [1, 1]} : vector<4x128xf32> to vector<1x128xf32>
    %212 = arith.mulf %210, %211 : vector<1x128xf32>
    %213 = vector.broadcast %212 : vector<1x128xf32> to vector<8x128xf32>
    %214 = arith.mulf %9, %213 : vector<8x128xf32>
    %215 = vector.extract_strided_slice %133 {offsets = [9, 0], sizes = [1, 128], strides = [1, 1]} : vector<16x128xf32> to vector<1x128xf32>
    %216 = vector.extract_strided_slice %147 {offsets = [2, 0], sizes = [1, 128], strides = [1, 1]} : vector<4x128xf32> to vector<1x128xf32>
    %217 = arith.mulf %215, %216 : vector<1x128xf32>
    %218 = vector.broadcast %217 : vector<1x128xf32> to vector<8x128xf32>
    %219 = arith.mulf %11, %218 : vector<8x128xf32>
    %220 = arith.addf %214, %219 : vector<8x128xf32>
    %221 = vector.extract_strided_slice %133 {offsets = [10, 0], sizes = [1, 128], strides = [1, 1]} : vector<16x128xf32> to vector<1x128xf32>
    %222 = vector.extract_strided_slice %147 {offsets = [2, 0], sizes = [1, 128], strides = [1, 1]} : vector<4x128xf32> to vector<1x128xf32>
    %223 = arith.mulf %221, %222 : vector<1x128xf32>
    %224 = vector.broadcast %223 : vector<1x128xf32> to vector<8x128xf32>
    %225 = arith.mulf %13, %224 : vector<8x128xf32>
    %226 = arith.addf %220, %225 : vector<8x128xf32>
    %227 = vector.extract_strided_slice %133 {offsets = [11, 0], sizes = [1, 128], strides = [1, 1]} : vector<16x128xf32> to vector<1x128xf32>
    %228 = vector.extract_strided_slice %147 {offsets = [2, 0], sizes = [1, 128], strides = [1, 1]} : vector<4x128xf32> to vector<1x128xf32>
    %229 = arith.mulf %227, %228 : vector<1x128xf32>
    %230 = vector.broadcast %229 : vector<1x128xf32> to vector<8x128xf32>
    %231 = arith.mulf %15, %230 : vector<8x128xf32>
    %232 = arith.addf %226, %231 : vector<8x128xf32>
    %233 = arith.truncf %232 : vector<8x128xf32> to vector<8x128xbf16>
    %cst_61 = arith.constant dense<0.000000e+00> : vector<8x128xf32>
    %234 = tpu.matmul %148, %233, %cst_61 {dimension_numbers = #tpu.dot_dimension_numbers<[1], [0], [0], [1], [0, 0, 1, 1], [], []>} : vector<8x8xbf16>, vector<8x128xbf16>, vector<8x128xf32> -> vector<8x128xf32>
    %235 = vector.broadcast %149 : vector<8x1xf32> to vector<8x128xf32>
    %236 = arith.addf %234, %235 : vector<8x128xf32>
    %c16_62 = arith.constant 16 : index
    %c0_63 = arith.constant 0 : index
    %237 = vector.load %arg2[%c16_62, %c0_63] : memref<32x128xf32, #tpu.memory_space<vmem>>, vector<8x128xf32>
    %238 = arith.addf %236, %237 : vector<8x128xf32>
    %c16_64 = arith.constant 16 : index
    %c0_65 = arith.constant 0 : index
    %239 = vector.load %arg5[%c16_64, %c0_65] : memref<32x128xf32, #tpu.memory_space<vmem>>, vector<8x128xf32>
    tpu.vector_store %arg5[%c16_64, %c0_65], %238 {strides = array<i32>} : memref<32x128xf32, #tpu.memory_space<vmem>>, vector<8x128xf32>,
    %240 = vector.extract_strided_slice %133 {offsets = [12, 0], sizes = [1, 128], strides = [1, 1]} : vector<16x128xf32> to vector<1x128xf32>
    %241 = vector.extract_strided_slice %147 {offsets = [3, 0], sizes = [1, 128], strides = [1, 1]} : vector<4x128xf32> to vector<1x128xf32>
    %242 = arith.mulf %240, %241 : vector<1x128xf32>
    %243 = vector.broadcast %242 : vector<1x128xf32> to vector<8x128xf32>
    %244 = arith.mulf %9, %243 : vector<8x128xf32>
    %245 = vector.extract_strided_slice %133 {offsets = [13, 0], sizes = [1, 128], strides = [1, 1]} : vector<16x128xf32> to vector<1x128xf32>
    %246 = vector.extract_strided_slice %147 {offsets = [3, 0], sizes = [1, 128], strides = [1, 1]} : vector<4x128xf32> to vector<1x128xf32>
    %247 = arith.mulf %245, %246 : vector<1x128xf32>
    %248 = vector.broadcast %247 : vector<1x128xf32> to vector<8x128xf32>
    %249 = arith.mulf %11, %248 : vector<8x128xf32>
    %250 = arith.addf %244, %249 : vector<8x128xf32>
    %251 = vector.extract_strided_slice %133 {offsets = [14, 0], sizes = [1, 128], strides = [1, 1]} : vector<16x128xf32> to vector<1x128xf32>
    %252 = vector.extract_strided_slice %147 {offsets = [3, 0], sizes = [1, 128], strides = [1, 1]} : vector<4x128xf32> to vector<1x128xf32>
    %253 = arith.mulf %251, %252 : vector<1x128xf32>
    %254 = vector.broadcast %253 : vector<1x128xf32> to vector<8x128xf32>
    %255 = arith.mulf %13, %254 : vector<8x128xf32>
    %256 = arith.addf %250, %255 : vector<8x128xf32>
    %257 = vector.extract_strided_slice %133 {offsets = [15, 0], sizes = [1, 128], strides = [1, 1]} : vector<16x128xf32> to vector<1x128xf32>
    %258 = vector.extract_strided_slice %147 {offsets = [3, 0], sizes = [1, 128], strides = [1, 1]} : vector<4x128xf32> to vector<1x128xf32>
    %259 = arith.mulf %257, %258 : vector<1x128xf32>
    %260 = vector.broadcast %259 : vector<1x128xf32> to vector<8x128xf32>
    %261 = arith.mulf %15, %260 : vector<8x128xf32>
    %262 = arith.addf %256, %261 : vector<8x128xf32>
    %263 = arith.truncf %262 : vector<8x128xf32> to vector<8x128xbf16>
    %cst_66 = arith.constant dense<0.000000e+00> : vector<8x128xf32>
    %264 = tpu.matmul %148, %263, %cst_66 {dimension_numbers = #tpu.dot_dimension_numbers<[1], [0], [0], [1], [0, 0, 1, 1], [], []>} : vector<8x8xbf16>, vector<8x128xbf16>, vector<8x128xf32> -> vector<8x128xf32>
    %265 = vector.broadcast %149 : vector<8x1xf32> to vector<8x128xf32>
    %266 = arith.addf %264, %265 : vector<8x128xf32>
    %c24_67 = arith.constant 24 : index
    %c0_68 = arith.constant 0 : index
    %267 = vector.load %arg2[%c24_67, %c0_68] : memref<32x128xf32, #tpu.memory_space<vmem>>, vector<8x128xf32>
    %268 = arith.addf %266, %267 : vector<8x128xf32>
    %c24_69 = arith.constant 24 : index
    %c0_70 = arith.constant 0 : index
    %269 = vector.load %arg5[%c24_69, %c0_70] : memref<32x128xf32, #tpu.memory_space<vmem>>, vector<8x128xf32>
    tpu.vector_store %arg5[%c24_69, %c0_70], %268 {strides = array<i32>} : memref<32x128xf32, #tpu.memory_space<vmem>>, vector<8x128xf32>,
    return
  }
  func.func @transform_0(%arg0: i32) -> (i32, i32) {
    %c0_i32 = arith.constant 0 : i32
    %c0_i32_0 = arith.constant 0 : i32
    return %c0_i32, %arg0 : i32, i32
  }
  func.func @transform_1(%arg0: i32) -> (i32, i32) {
    %c0_i32 = arith.constant 0 : i32
    %c0_i32_0 = arith.constant 0 : i32
    return %c0_i32, %arg0 : i32, i32
  }
  func.func @transform_2(%arg0: i32) -> (i32, i32) {
    %c0_i32 = arith.constant 0 : i32
    %c0_i32_0 = arith.constant 0 : i32
    %c0_i32_1 = arith.constant 0 : i32
    return %c0_i32, %c0_i32_0 : i32, i32
  }
  func.func @transform_3(%arg0: i32) -> (i32, i32) {
    %c0_i32 = arith.constant 0 : i32
    %c0_i32_0 = arith.constant 0 : i32
    %c0_i32_1 = arith.constant 0 : i32
    return %c0_i32, %c0_i32_0 : i32, i32
  }
  func.func @transform_4(%arg0: i32) -> (i32, i32) {
    %c0_i32 = arith.constant 0 : i32
    %c0_i32_0 = arith.constant 0 : i32
    return %c0_i32, %arg0 : i32, i32
  }
}

</mosaic_0001>

<bundles_post_ra>
// kernel: attention_pe_forward.2
= control target key start
LH: loop header
LB: loop body
LE: loop exit
PB: predicated region body
PF: predicated region fallthrough
CT: control target
= control target key end

     0   :  { %s1022_s18 = smov 0   ;;  %s1024_s19 = smov 0   ;;  %s1253_s0 = inlined_call_operand.vmem [shape: f32[8,1408], index: 0, kind: input, shape index: {}]   ;;  %s1254_s1 = inlined_call_operand.vmem [shape: f32[1,1408], index: 1, kind: input, shape index: {}]   ;;  %s1255_s2 = inlined_call_operand.vmem [shape: f32[1,1408], index: 2, kind: input, shape index: {}]   ;;  %s1256_s3 = inlined_call_operand.vmem [shape: bf16[32,144], index: 3, kind: input, shape index: {}]   ;;  %s1257_s4 = inlined_call_operand.vmem [shape: f32[32,1], index: 4, kind: input, shape index: {}]   ;;  %s1258_s5 = inlined_call_operand.vmem [shape: bf16[32,1152], index: 5, kind: output, shape index: {}]  }
   0x1   :  { %s1026_s20 = smov 0  }
   0x2 LB: > { %s1035_s21 = sadd.s32 4294967295, %s980_s20   ;;  %s1037_s22 = sadd.s32 1, %s980_s20   ;;  %s980_s20 = sphi %s1026_s20, %s1262_s20   ;;  %s976_s19 = sphi %s1024_s19, %s1261_s19   ;;  %s972_s18 = sphi %s1022_s18, %s1260_s18  }
   0x3   : > { %s124_s23 = ssub.s32 %s980_s20, %s1037_s22  ;;  %s127_s24 = sadd.s32 1, %s976_s19 }
   0x4   : > { %p125_p0 = scmp.eq.s32.totalorder %s124_s23, 0  ;;  %p137_p1 = scmp.ne.s32.totalorder %s976_s19, %s972_s18 }
   0x5   : > { %p138_p2 = scmp.eq.s32.totalorder %s1035_s21, 2  ;;  %p867_p3 = scmp.ge.s32.totalorder %s980_s20, 1 }
   0x6   : > { %s1045_s25 = scalar_select %p125_p0, %s976_s19, %s127_s24  }
   0x7   : > { %p1047_p4 = por %p138_p2, %p137_p1  ;;  %p177_p5 = scmp.lt.s32.totalorder %s980_s20, 4 }
   0x9   : > { %p178_p6 = pnand %p867_p3, %p177_p5 }
   0xa   : > { %v201_v0 = vld [vmem:[%s1253_s0] sm:$0xff] (!%p178_p6)  ;;  %v202_v1 = vld [vmem:[%s1253_s0 + $0x8] sm:$0xff] (!%p178_p6)  ;;  %v203_v2 = vld [vmem:[%s1253_s0 + $0x10] sm:$0xff] (!%p178_p6)  ;;  %v240_v21 = vlaneseq (!%p178_p6)  ;;  %s332_s9 = smul.u32 (!%p178_p6), 384, %s1035_s21  ;;  %vm418_vm0 = vcmask (!%p178_p6), 1040384   ;;  %vm433_vm1 = vcmask (!%p178_p6), 162816  }
   0xb   : > { %181 = sbr.rel (%p178_p6) target bundleno = 793 (0x319), region = 40  ;;  %v214_v3 = vadd.f32 (!%p178_p6), %v202_v1, %v201_v0  ;;  %v204_v4 = vld [vmem:[%s1253_s0 + $0x18] sm:$0xff] (!%p178_p6)  ;;  %v205_v5 = vld [vmem:[%s1253_s0 + $0x20] sm:$0xff] (!%p178_p6)  ;;  %v206_v8 = vld [vmem:[%s1253_s0 + $0x28] sm:$0xff] (!%p178_p6)  ;;  %vm983_vm2 = vmmov (!%p178_p6), 1   ;;  %s984_s27 = smov (!%p178_p6), 126  }
   0xc   : > { %v207_v10 = vld [vmem:[%s1253_s0 + $0x30] sm:$0xff] (!%p178_p6)  ;;  %v208_v12 = vld [vmem:[%s1253_s0 + $0x38] sm:$0xff] (!%p178_p6)  ;;  %v1078_v14 = vld [vmem:[%s1253_s0 + $0x40] sm:$0xff] (!%p178_p6)  ;;  %v241_v22 = vshrl.u32 (!%p178_p6), %v240_v21, 7  ;;  %s333_s10 = sshra.s32 (!%p178_p6), %s332_s9, 7  ;;  %s985_s28 = smov (!%p178_p6), 56  }
   0xd   : > { %v215_v6 = vadd.f32 (!%p178_p6), %v214_v3, %v203_v2  ;;  %v1083_v16 = vld [vmem:[%s1253_s0 + $0x48] sm:$0xff] (!%p178_p6)  ;;  %v1089_v18 = vld [vmem:[%s1253_s0 + $0x50] sm:$0xff] (!%p178_p6)  ;;  %v212_v24 = vld [vmem:[%s1254_s1] sm:$0xff] (!%p178_p6)  ;;  %s868_s11 = sshll.u32 (!%p178_p6), %s333_s10, 3  ;;  %s344_s14 = scalar_lea.vmem (!%p178_p6), %s1255_s2, %s333_s10  ;;  %vm611_vm4 = vcmask (!%p178_p6), 130048   ;;  %vm452_vm5 = vcmask (!%p178_p6), 1031168  }
   0xe   : > { %v1093_v23 = vsub.s32 (!%p178_p6), 0, %v241_v22  ;;  %v1098_v25 = vsub.s32 (!%p178_p6), 1, %v241_v22  ;;  %v1100_v26 = vsub.s32 (!%p178_p6), 2, %v241_v22  ;;  %v1105_v30 = vsub.s32 (!%p178_p6), 3, %v241_v22  ;;  %v213_v53 = vld [vmem:[%s1254_s1 + $0x8] sm:$0x7] (!%p178_p6)  ;;  %s336_s17 = scalar_lea.vmem (!%p178_p6), %s1253_s0, %s868_s11  ;;  %s342_s24 = scalar_lea.vmem (!%p178_p6), %s1254_s1, %s333_s10  ;;  %vm949_vm3 = vmpackc.low (!%p178_p6), %vm418_vm0, %vm983_vm2 }
   0xf   : > { %v216_v7 = vadd.f32 (!%p178_p6), %v215_v6, %v204_v4  ;;  %v1108_v32 = vsub.s32 (!%p178_p6), 4, %v241_v22  ;;  %v262_v39 = vsub.s32 (!%p178_p6), 5, %v241_v22  ;;  %v266_v41 = vsub.s32 (!%p178_p6), 6, %v241_v22  ;;  %s986_s29 = smov (!%p178_p6), 124   ;;  %s987_s30 = smov (!%p178_p6), 54  }
  0x10   : > { %v243_v29 = vrot.slane (!%p178_p6), %v212_v24, %v1093_v23  ;;  %v247_v31 = vrot.slane (!%p178_p6), %v212_v24, %v1098_v25  ;;  %v251_v36 = vrot.slane (!%p178_p6), %v212_v24, %v1100_v26  ;;  %v255_v38 = vrot.slane (!%p178_p6), %v212_v24, %v1105_v30  ;;  %s988_s6 = smov (!%p178_p6), 52   ;;  %s989_s7 = smov (!%p178_p6), 112  }
  0x11   : > { %v217_v9 = vadd.f32 (!%p178_p6), %v216_v7, %v205_v5  ;;  %v259_v44 = vrot.slane (!%p178_p6), %v212_v24, %v1108_v32  ;;  %v270_v46 = vsub.s32 (!%p178_p6), 7, %v241_v22  ;;  %v263_v50 = vrot.slane (!%p178_p6), %v212_v24, %v262_v39  ;;  %v339_v39 = vld [vmem:[%s336_s17 + $0x10] sm:$0xff] (!%p178_p6)  ;;  %s990_s8 = smov (!%p178_p6), 110   ;;  %s991_s9 = smov (!%p178_p6), 108  }
  0x12   : > { %v267_v52 = vrot.slane %v212_v24, %v266_v41  ;;  %v275_v63 = vrot.slane %v213_v53, %v1093_v23  ;;  %v341_v41 = vld [vmem:[%s336_s17 + $0x20] sm:$0xff]  ;;  %vm467_vm6 = vcmask 1014784   ;;  %vm482_vm7 = vcmask 457728  }
  0x13   : > { %v218_v11 = vadd.f32 %v217_v9, %v206_v8  ;;  %v271_v58 = vrot.slane %v212_v24, %v270_v46  ;;  %v283_v9 = vrot.slane %v213_v53, %v1100_v26  ;;  %vm497_vm8 = vcmask 441344  }
  0x14   : > { %vm512_vm9 = vcmask 424960   ;;  %vm528_vm10 = vcmask 916480   ;;  %vm543_vm11 = vcmask 900096   ;;  %vm558_vm12 = vcmask 883712  }
  0x15   : > { %v219_v13 = vadd.f32 %v218_v11, %v207_v10 }
  0x17   : > { %v220_v15 = vadd.f32 %v219_v13, %v208_v12 }
  0x19   : > { %v221_v17 = vadd.f32 %v220_v15, %v1078_v14 }
  0x1b   : > { %v222_v19 = vadd.f32 %v221_v17, %v1083_v16 }
  0x1d   : > { %v223_v20 = vadd.f32 %v222_v19, %v1089_v18 }
  0x1f   : > { %224 = vadd.xlane.f32.xlu0 %v223_v20 }
  0xac   : > { %v225_v27 = vpop.xlane.xlu0 %224 }
  0xad   : > { %v1102_v28 = vmul.f32 0.0009765625, %v225_v27 }
  0xaf   : > { %v227_v33 = vsub.f32 %v201_v0, %v1102_v28  ;;  %v228_v34 = vsub.f32 %v202_v1, %v1102_v28  ;;  %v229_v35 = vsub.f32 %v203_v2, %v1102_v28  ;;  %v230_v37 = vsub.f32 %v204_v4, %v1102_v28 }
  0xb0   : > { %v231_v43 = vsub.f32 %v205_v5, %v1102_v28  ;;  %v232_v49 = vsub.f32 %v206_v8, %v1102_v28  ;;  %v233_v54 = vsub.f32 %v207_v10, %v1102_v28  ;;  %v234_v59 = vsub.f32 %v208_v12, %v1102_v28 }
  0xb1   : > { %v295_v40 = vmul.f32 %v243_v29, %v227_v33  ;;  %v296_v42 = vmul.f32 %v247_v31, %v228_v34  ;;  %v297_v45 = vmul.f32 %v251_v36, %v229_v35  ;;  %v298_v51 = vmul.f32 %v255_v38, %v230_v37  ;;  %v345_v35 = vld [vmem:[%s344_s14] sm:$0x1f]  ;;  %v338_v38 = vld [vmem:[%s336_s17 + $0x8] sm:$0xff] }
  0xb2   : > { %v299_v55 = vmul.f32 %v259_v44, %v231_v43  ;;  %v300_v60 = vmul.f32 %v263_v50, %v232_v49  ;;  %v235_v0 = vsub.f32 %v1078_v14, %v1102_v28  ;;  %v301_v1 = vmul.f32 %v267_v52, %v233_v54  ;;  %v337_v36 = vld [vmem:[%s336_s17] sm:$0xff] }
  0xb3   : > { %v306_v47 = vmul.f32 %v295_v40, %v295_v40  ;;  %v307_v48 = vmul.f32 %v296_v42, %v296_v42  ;;  %v308_v56 = vmul.f32 %v297_v45, %v297_v45  ;;  %v309_v61 = vmul.f32 %v298_v51, %v298_v51  ;;  %v343_v37 = vld [vmem:[%s342_s24] sm:$0x1f]  ;;  %v340_v40 = vld [vmem:[%s336_s17 + $0x18] sm:$0xff] }
  0xb4   : > { %v310_v2 = vmul.f32 %v299_v55, %v299_v55  ;;  %v279_v4 = vrot.slane %v213_v53, %v1098_v25  ;;  %v236_v5 = vsub.f32 %v1083_v16, %v1102_v28  ;;  %v302_v6 = vmul.f32 %v271_v58, %v234_v59 }
  0xb5   : > { %v317_v57 = vadd.f32 %v307_v48, %v306_v47  ;;  %v311_v7 = vmul.f32 %v300_v60, %v300_v60  ;;  %v237_v10 = vsub.f32 %v1089_v18, %v1102_v28  ;;  %v303_v11 = vmul.f32 %v275_v63, %v235_v0 }
  0xb6   : > { %v312_v12 = vmul.f32 %v301_v1, %v301_v1  ;;  %v304_v14 = vmul.f32 %v279_v4, %v236_v5  ;;  %v313_v15 = vmul.f32 %v302_v6, %v302_v6  ;;  %v982_v31 = vmov 0  }
  0xb7   : > { %v318_v62 = vadd.f32 %v317_v57, %v308_v56  ;;  %v305_v19 = vmul.f32 %v283_v9, %v237_v10  ;;  %v314_v20 = vmul.f32 %v303_v11, %v303_v11  ;;  %671 = vmatprep.subr.bf16.mxu1 %v982_v31  ;;  %939 = vset.pattern.permute.xlu1 %v982_v31 }
  0xb8   : > { %v315_v22 = vmul.f32 %v304_v14, %v304_v14  ;;  %940 = vset.pattern.permute.xlu0 %v982_v31  ;;  %v360_v42 = vrot.slane %v345_v35, %v1093_v23  ;;  %v364_v43 = vrot.slane %v345_v35, %v1098_v25  ;;  %v368_v44 = vrot.slane %v345_v35, %v1100_v26 }
  0xb9   : > { %v319_v3 = vadd.f32 %v318_v62, %v309_v61  ;;  %v316_v24 = vmul.f32 %v305_v19, %v305_v19  ;;  %v372_v45 = vrot.slane %v345_v35, %v1105_v30  ;;  %v376_v46 = vrot.slane %v345_v35, %v1108_v32  ;;  %v943_v19 = vld [vmem:[%s1256_s3 + $0x4] ss:$8 sps:$4 sm:$0xff]  }
  0xba   : > { %v391_v47 = vrot.slane %v343_v37, %v1093_v23  ;;  %v395_v48 = vrot.slane %v343_v37, %v1098_v25  ;;  %v346_v49 = vsub.f32 %v337_v36, %v1102_v28  ;;  %v347_v50 = vsub.f32 %v338_v38, %v1102_v28  ;;  %875 = vmatprep.mubr.msk.bf16.mxu1 %vm611_vm4, %v943_v19 }
  0xbb   : > { %v320_v8 = vadd.f32 %v319_v3, %v310_v2  ;;  %v348_v51 = vsub.f32 %v339_v39, %v1102_v28  ;;  %v349_v52 = vsub.f32 %v340_v40, %v1102_v28  ;;  %v350_v54 = vsub.f32 %v341_v41, %v1102_v28  ;;  %873 = vmatprep.mubr.msk.bf16.mxu0 %vm611_vm4, %v943_v19 }
  0xbc   : > { %v399_v55 = vrot.slane %v343_v37, %v1100_v26  ;;  %v403_v56 = vrot.slane %v343_v37, %v1105_v30  ;;  %v407_v57 = vrot.slane %v343_v37, %v1108_v32  ;;  %v419_v60 = vsel %vm418_vm0, %v391_v47, 0.0 }
  0xbd   : > { %v321_v13 = vadd.f32 %v320_v8, %v311_v7  ;;  %v420_v61 = vsel %vm418_vm0, %v395_v48, 0.0 }
  0xbe   : > { %v421_v28 = vsel %vm418_vm0, %v399_v55, 0.0  ;;  %v422_v26 = vsel %vm418_vm0, %v403_v56, 0.0  ;;  %v423_v30 = vsel %vm418_vm0, %v407_v57, 0.0 }
  0xbf   : > { %v322_v17 = vadd.f32 %v321_v13, %v312_v12 }
  0xc1   : > { %v323_v21 = vadd.f32 %v322_v17, %v313_v15 }
  0xc3   : > { %v324_v16 = vadd.f32 %v323_v21, %v314_v20  ;;  %v570_v20 = vld [vmem:[%s1257_s4 + $0x8] sm:$0xff]  ;;  %v569_v21 = vld [vmem:[%s1257_s4] sm:$0xff] }
  0xc5   : > { %v325_v27 = vadd.f32 %v324_v16, %v315_v22  ;;  %v571_v22 = vld [vmem:[%s1257_s4 + $0x10] sm:$0xff]  ;;  %v572_v16 = vld [vmem:[%s1257_s4 + $0x18] sm:$0xff] }
  0xc7   : > { %v326_v29 = vadd.f32 %v325_v27, %v316_v24 }
  0xc9   : > { %327 = vadd.xlane.f32.xlu0 %v326_v29 }
 0x156   : > { %v328_v18 = vpop.xlane.xlu0 %327 }
 0x157   : > { %v329_v33 = vmul.f32 0.0009765625, %v328_v18 }
 0x159   : > { %v330_v34 = vadd.f32 1e-05, %v329_v33 }
 0x15b   : > { %947 = vrsqrt.f32 %v330_v34 }
 0x165   : > { %v948_v53 = vpop.eup %947 }
 0x166   : > { %v353_v23 = vmul.f32 %v948_v53, %v348_v51  ;;  %v352_v58 = vmul.f32 %v948_v53, %v347_v50  ;;  %v351_v25 = vmul.f32 %v948_v53, %v346_v49  ;;  %v354_v59 = vmul.f32 %v948_v53, %v349_v52 }
 0x167   : > { %v355_v62 = vmul.f32 %v948_v53, %v350_v54 }
 0x168   : > { %v384_v63 = vadd.f32 %v368_v44, %v353_v23  ;;  %v383_v0 = vadd.f32 %v364_v43, %v352_v58  ;;  %v382_v1 = vadd.f32 %v360_v42, %v351_v25  ;;  %v385_v2 = vadd.f32 %v372_v45, %v354_v59 }
 0x169   : > { %v386_v32 = vadd.f32 %v376_v46, %v355_v62 }
 0x16a   : > { %v415_v3 = vmul.f32 %v399_v55, %v384_v63  ;;  %v414_v4 = vmul.f32 %v395_v48, %v383_v0  ;;  %v413_v5 = vmul.f32 %v391_v47, %v382_v1  ;;  %v416_v6 = vmul.f32 %v403_v56, %v385_v2 }
 0x16b   : > { %v417_v7 = vmul.f32 %v407_v57, %v386_v32 }
 0x16c   : > { %v426_v8 = vpack.c.bf16 %v421_v28, %v415_v3  ;;  %v425_v9 = vpack.c.bf16 %v420_v61, %v414_v4  ;;  %v424_v10 = vpack.c.bf16 %v419_v60, %v413_v5  ;;  %v427_v11 = vpack.c.bf16 %v422_v26, %v416_v6 }
 0x16d   : > { %v428_v12 = vpack.c.bf16 %v423_v30, %v417_v7  ;;  %v950_v13 = vpack.c.bf16 %v399_v55, %v415_v3  ;;  %v953_v14 = vpack.c.bf16 %v395_v48, %v414_v4  ;;  %v956_v15 = vpack.c.bf16 %v391_v47, %v413_v5  ;;  %v941_v3 = vld [vmem:[%s1256_s3] ss:$8 sps:$4 sm:$0xff]   ;;  %v944_v4 = vld [vmem:[%s1256_s3 + $0x14] ss:$8 sps:$4 sm:$0xff]  }
 0x16e   : > { %446 = vrot.lane.b32.xlu1 %v425_v9, %s984_s27  ;;  %444 = vrot.lane.b32.xlu0 %v424_v10, %s984_s27 }
 0x16f   : > { %951 = vmatpush1.bf16.msk.msra.mxu1 %vm949_vm3, %v950_v13  ;;  %954 = vmatprep.subr.msk.bf16.mxu0 %vm949_vm3, %v953_v14  ;;  %434 = vst.msk [vmem:[#allocation2 + $0x20] sm:$0xff] %vm433_vm1, %v428_v12 }
 0x170   : > { %957 = vmatpush1.bf16.msk.msra.mxu0 %vm949_vm3, %v956_v15  ;;  %673 = vmatprep.subr.bf16.mxu1 %v982_v31 }
 0x172   : > { %448 = vrot.lane.b32.xlu1 %v426_v8, %s984_s27  ;;  %478 = vrot.lane.b32.xlu0 %v426_v8, %s985_s28 }
 0x176   : > { %450 = vrot.lane.b32.xlu1 %v427_v11, %s984_s27  ;;  %480 = vrot.lane.b32.xlu0 %v427_v11, %s985_s28  ;;  %v439_v17 = vld [vmem:[#allocation2 + $0x20] sm:$0xff] }
 0x17a   : > { %461 = vrot.lane.b32.xlu1 %v425_v9, %s986_s29  ;;  %493 = vrot.lane.b32.xlu0 %v426_v8, %s987_s30 }
 0x17e   : > { %463 = vrot.lane.b32.xlu1 %v426_v8, %s986_s29  ;;  %495 = vrot.lane.b32.xlu0 %v427_v11, %s987_s30 }
 0x182   : > { %459 = vrot.lane.b32.xlu1 %v424_v10, %s986_s29  ;;  %508 = vrot.lane.b32.xlu0 %v426_v8, %s988_s6 }
 0x186   : > { %465 = vrot.lane.b32.xlu1 %v427_v11, %s986_s29  ;;  %510 = vrot.lane.b32.xlu0 %v427_v11, %s988_s6 }
 0x18a   : > { %476 = vrot.lane.b32.xlu1 %v425_v9, %s985_s28  ;;  %524 = vrot.lane.b32.xlu0 %v427_v11, %s989_s7 }
 0x18e   : > { %474 = vrot.lane.b32.xlu1 %v424_v10, %s985_s28  ;;  %526 = vrot.lane.b32.xlu0 %v439_v17, %s989_s7 }
 0x192   : > { %491 = vrot.lane.b32.xlu1 %v425_v9, %s987_s30  ;;  %539 = vrot.lane.b32.xlu0 %v427_v11, %s990_s8 }
 0x196   : > { %489 = vrot.lane.b32.xlu1 %v424_v10, %s987_s30  ;;  %541 = vrot.lane.b32.xlu0 %v439_v17, %s990_s8 }
 0x19a   : > { %506 = vrot.lane.b32.xlu1 %v425_v9, %s988_s6  ;;  %554 = vrot.lane.b32.xlu0 %v427_v11, %s991_s9 }
 0x19e   : > { %504 = vrot.lane.b32.xlu1 %v424_v10, %s988_s6  ;;  %556 = vrot.lane.b32.xlu0 %v439_v17, %s991_s9 }
 0x1a2   : > { %522 = vrot.lane.b32.xlu1 %v426_v8, %s989_s7  ;;  %580 = vperm.xlu0 %940, %v570_v20  }
 0x1a6   : > { %520 = vrot.lane.b32.xlu1 %v425_v9, %s989_s7  ;;  %s196_s7 = sand.u32 1, %s972_s18   ;;  %s904_s18 = smul.u32 (%p1047_p4), 12, %s1035_s21 }
 0x1a8   : > { %s777_s26 = scalar_lea.vmem (%p1047_p4), %s1258_s5, %s904_s18 }
 0x1aa   : > { %537 = vrot.lane.b32.xlu1 %v426_v8, %s990_s8 }
 0x1ae   : > { %535 = vrot.lane.b32.xlu1 %v425_v9, %s990_s8  ;;  %s905_s8 = smul.u32 48, %s196_s7 }
 0x1b2   : > { %552 = vrot.lane.b32.xlu1 %v426_v8, %s991_s9  ;;  %v946_v8 = vld [vmem:[%s1256_s3 + $0x10] ss:$8 sps:$4 sm:$0xff]  }
 0x1b6   : > { %550 = vrot.lane.b32.xlu1 %v425_v9, %s991_s9  ;;  %s1219_s9 = scalar_lea.vmem [#allocation3], %s905_s8 }
 0x1ba   : > { %575 = vperm.xlu1 %939, %v569_v21  }
 0x1be   : > { %585 = vperm.xlu1 %939, %v571_v22  }
 0x1c2   : > { %590 = vperm.xlu1 %939, %v572_v16  }
 0x1e0   : > { %v447_v24 = vpop.permute.xlu1 %446  ;;  %v445_v27 = vpop.permute.xlu0 %444 }
 0x1e1   : > { %v453_v34 = vsel %vm452_vm5, %v445_v27, %v447_v24 }
 0x1e4   : > { %v449_v29 = vpop.permute.xlu1 %448  ;;  %v479_v18 = vpop.permute.xlu0 %478 }
 0x1e5   : > { %v454_v33 = vsel %vm452_vm5, %v447_v24, %v449_v29 }
 0x1e6   : > { %620 = vmatprep.subr.bf16.mxu0 %v454_v33 }
 0x1e7   : > { %621 = vmatpush1.bf16.msra.mxu0 %v453_v34 }
 0x1e8   : > { %v451_v35 = vpop.permute.xlu1 %450  ;;  %v481_v36 = vpop.permute.xlu0 %480 }
 0x1e9   : > { %v455_v37 = vsel %vm452_vm5, %v449_v29, %v451_v35  ;;  %v485_v52 = vsel %vm482_vm7, %v479_v18, %v481_v36 }
 0x1ea   : > { %674 = vmatpush1.bf16.msra.mxu1 %v455_v37 }
 0x1eb   : > { %675 = vmatprep.subr.bf16.mxu1 %v982_v31 }
 0x1ec   : > { %v462_v38 = vpop.permute.xlu1 %461  ;;  %v494_v39 = vpop.permute.xlu0 %493 }
 0x1f0   : > { %v464_v40 = vpop.permute.xlu1 %463  ;;  %v496_v41 = vpop.permute.xlu0 %495 }
 0x1f1   : > { %v469_v42 = vsel %vm467_vm6, %v462_v38, %v464_v40  ;;  %v500_v56 = vsel %vm497_vm8, %v494_v39, %v496_v41 }
 0x1f2   : > { %622 = vmatprep.subr.bf16.mxu0 %v469_v42 }
 0x1f4   : > { %v460_v43 = vpop.permute.xlu1 %459  ;;  %v509_v44 = vpop.permute.xlu0 %508 }
 0x1f5   : > { %v468_v45 = vsel %vm467_vm6, %v460_v43, %v462_v38 }
 0x1f6   : > { %623 = vmatpush1.bf16.msra.mxu0 %v468_v45 }
 0x1f8   : > { %v466_v46 = vpop.permute.xlu1 %465  ;;  %v511_v47 = vpop.permute.xlu0 %510 }
 0x1f9   : > { %v470_v48 = vsel %vm467_vm6, %v464_v40, %v466_v46  ;;  %v515_v25 = vsel %vm512_vm9, %v509_v44, %v511_v47 }
 0x1fa   : > { %676 = vmatpush1.bf16.msra.mxu1 %v470_v48 }
 0x1fb   : > { %677 = vmatprep.subr.bf16.mxu1 %v982_v31 }
 0x1fc   : > { %v477_v49 = vpop.permute.xlu1 %476  ;;  %v525_v50 = vpop.permute.xlu0 %524 }
 0x1fd   : > { %v484_v51 = vsel %vm482_vm7, %v477_v49, %v479_v18 }
 0x1fe   : > { %624 = vmatprep.subr.bf16.mxu0 %v484_v51  ;;  %678 = vmatpush1.bf16.msra.mxu1 %v485_v52 }
 0x1ff   : > { %679 = vmatprep.subr.bf16.mxu1 %v982_v31 }
 0x200   : > { %v475_v53 = vpop.permute.xlu1 %474  ;;  %v527_v54 = vpop.permute.xlu0 %526 }
 0x201   : > { %v483_v55 = vsel %vm482_vm7, %v475_v53, %v477_v49  ;;  %v531_v62 = vsel %vm528_vm10, %v525_v50, %v527_v54 }
 0x202   : > { %625 = vmatpush1.bf16.msra.mxu0 %v483_v55  ;;  %680 = vmatpush1.bf16.msra.mxu1 %v500_v56 }
 0x203   : > { %681 = vmatprep.subr.bf16.mxu1 %v982_v31 }
 0x204   : > { %v492_v57 = vpop.permute.xlu1 %491  ;;  %v540_v23 = vpop.permute.xlu0 %539 }
 0x205   : > { %v499_v58 = vsel %vm497_vm8, %v492_v57, %v494_v39 }
 0x206   : > { %626 = vmatprep.subr.bf16.mxu0 %v499_v58  ;;  %682 = vmatpush1.bf16.msra.mxu1 %v515_v25 }
 0x207   : > { %683 = vmatprep.subr.bf16.mxu1 %v982_v31 }
 0x208   : > { %v490_v59 = vpop.permute.xlu1 %489  ;;  %v542_v60 = vpop.permute.xlu0 %541 }
 0x209   : > { %v498_v61 = vsel %vm497_vm8, %v490_v59, %v492_v57  ;;  %v546_v2 = vsel %vm543_vm11, %v540_v23, %v542_v60 }
 0x20a   : > { %627 = vmatpush1.bf16.msra.mxu0 %v498_v61  ;;  %684 = vmatpush1.bf16.msra.mxu1 %v531_v62 }
 0x20b   : > { %685 = vmatprep.subr.bf16.mxu1 %v982_v31 }
 0x20c   : > { %v507_v63 = vpop.permute.xlu1 %506  ;;  %v555_v0 = vpop.permute.xlu0 %554 }
 0x20d   : > { %v514_v1 = vsel %vm512_vm9, %v507_v63, %v509_v44 }
 0x20e   : > { %628 = vmatprep.subr.bf16.mxu0 %v514_v1  ;;  %686 = vmatpush1.bf16.msra.mxu1 %v546_v2 }
 0x20f   : > { %687 = vmatprep.subr.bf16.mxu1 %v982_v31 }
 0x210   : > { %v505_v28 = vpop.permute.xlu1 %504  ;;  %v557_v26 = vpop.permute.xlu0 %556 }
 0x211   : > { %v513_v30 = vsel %vm512_vm9, %v505_v28, %v507_v63  ;;  %v561_v32 = vsel %vm558_vm12, %v555_v0, %v557_v26 }
 0x212   : > { %629 = vmatpush1.bf16.msra.mxu0 %v513_v30  ;;  %688 = vmatpush1.bf16.msra.mxu1 %v561_v32 }
 0x214   : > { %v523_v5 = vpop.permute.xlu1 %522 }
 0x215   : > { %v530_v31 = vsel %vm528_vm10, %v523_v5, %v525_v50  ;;  %704 = vmatmul.mubr.bf16.vlgmr.msra.gmra.mrb[0].mxu1 %v941_v3 }
 0x216   : > { %630 = vmatprep.subr.bf16.mxu0 %v530_v31  ;;  %876 = vmatprep.mubr.msk.bf16.mxu1 %vm611_vm4, %v944_v4 }
 0x218   : > { %v521_v6 = vpop.permute.xlu1 %520 }
 0x219   : > { %v529_v7 = vsel %vm528_vm10, %v521_v6, %v523_v5 }
 0x21a   : > { %631 = vmatpush1.bf16.msra.mxu0 %v529_v7 }
 0x21c   : > { %v538_v9 = vpop.permute.xlu1 %537 }
 0x21d   : > { %v545_v10 = vsel %vm543_vm11, %v538_v9, %v540_v23  ;;  %712 = vmatmul.mubr.bf16.gmra.mrb[4].mxu1 %v946_v8 }
 0x21e   : > { %632 = vmatprep.subr.bf16.mxu0 %v545_v10 }
 0x220   : > { %v536_v11 = vpop.permute.xlu1 %535 }
 0x221   : > { %v544_v12 = vsel %vm543_vm11, %v536_v11, %v538_v9  ;;  %v581_v21 = vpop.permute.xlu0 %580 }
 0x222   : > { %633 = vmatpush1.bf16.msra.mxu0 %v544_v12 }
 0x224   : > { %v553_v13 = vpop.permute.xlu1 %552 }
 0x225   : > { %v560_v14 = vsel %vm558_vm12, %v553_v13, %v555_v0 }
 0x226   : > { %634 = vmatprep.subr.bf16.mxu0 %v560_v14 }
 0x228   : > { %v551_v15 = vpop.permute.xlu1 %550 }
 0x229   : > { %v559_v17 = vsel %vm558_vm12, %v551_v15, %v553_v13 }
 0x22a   : > { %635 = vmatpush1.bf16.msra.mxu0 %v559_v17 }
 0x22d   : > { %651 = vmatmul.mubr.bf16.vlgmr.msra.gmra.mrb[0].mxu0 %v941_v3 }
 0x22e   : > { %874 = vmatprep.mubr.msk.bf16.mxu0 %vm611_vm4, %v944_v4 }
 0x235   : > { %661 = vmatmul.mubr.bf16.gmra.mrb[4].mxu0 %v946_v8 }
 0x239   : > { %v576_v19 = vpop.permute.xlu1 %575 }
 0x23d   : > { %v586_v24 = vpop.permute.xlu1 %585 }
 0x241   : > { %v591_v36 = vpop.permute.xlu1 %590 }
 0x2e8   : > { %v705_v20 = vpop.f32.mrb[0].mxu1 }
 0x2e9   : > { %v706_v22 = vadd.f32 %v705_v20, %v576_v19  ;;  %v707_v16 = vpop.f32.mrb[1].mxu1 }
 0x2ea   : > { %v708_v27 = vpop.f32.mrb[2].mxu1 }
 0x2eb   : > { %v897_v29 = vpack.c.bf16 %v706_v22, %v706_v22  ;;  %v710_v18 = vpop.f32.mrb[3].mxu1  ;;  %v709_v33 = vadd.f32 %v708_v27, %v581_v21 }
 0x2ed   : > { %761 = vst [vmem:[%s1219_s9 + $0x8] sm:$0xf] %v897_v29  ;;  %v899_v34 = vpack.c.bf16 %v709_v33, %v709_v33 }
 0x2ef   : > { %763 = vst [vmem:[%s1219_s9 + $0x14] sm:$0xf] %v899_v34 }
 0x2f0   : > { %v713_v35 = vpop.f32.mrb[4].mxu1 }
 0x2f1   : > { %v714_v37 = vadd.f32 %v713_v35, %v586_v24  ;;  %v715_v38 = vpop.f32.mrb[5].mxu1 }
 0x2f2   : > { %v716_v39 = vpop.f32.mrb[6].mxu1 }
 0x2f3   : > { %v901_v40 = vpack.c.bf16 %v714_v37, %v714_v37  ;;  %v717_v41 = vadd.f32 %v716_v39, %v591_v36  ;;  %v718_v42 = vpop.f32.mrb[7].mxu1 }
 0x2f4   : > { %v886_v2 = vld [vmem:[%s1219_s9 + $0x8] sm:$0xf] (%p1047_p4) }
 0x2f5   : > { %765 = vst [vmem:[%s1219_s9 + $0x20] sm:$0xf] %v901_v40  ;;  %v903_v43 = vpack.c.bf16 %v717_v41, %v717_v41  ;;  %887 = vst [vmem:[%s777_s26 + $0x8] sm:$0xf] (%p1047_p4), %v886_v2 }
 0x2f6   : > { %v888_v28 = vld [vmem:[%s1219_s9 + $0x14] sm:$0xf] (%p1047_p4) }
 0x2f7   : > { %767 = vst [vmem:[%s1219_s9 + $0x2c] sm:$0xf] %v903_v43  ;;  %889 = vst [vmem:[%s777_s26 + $0x2c] sm:$0xf] (%p1047_p4), %v888_v28 }
 0x2fc   : > { %v890_v26 = vld [vmem:[%s1219_s9 + $0x20] sm:$0xf] (%p1047_p4) }
 0x2fd   : > { %891 = vst [vmem:[%s777_s26 + $0x50] sm:$0xf] (%p1047_p4), %v890_v26 }
 0x2fe   : > { %v892_v30 = vld [vmem:[%s1219_s9 + $0x2c] sm:$0xf] (%p1047_p4) }
 0x2ff   : > { %893 = vst [vmem:[%s777_s26 + $0x74] sm:$0xf] (%p1047_p4), %v892_v30 }
 0x300   : > { %v652_v44 = vpop.f32.mrb[0].mxu0 }
 0x301   : > { %v653_v45 = vadd.f32 %v652_v44, %v576_v19  ;;  %v654_v46 = vpop.f32.mrb[1].mxu0 }
 0x302   : > { %v655_v47 = vadd.f32 %v654_v46, %v576_v19  ;;  %v656_v48 = vpop.f32.mrb[2].mxu0 }
 0x303   : > { %v657_v49 = vadd.f32 %v656_v48, %v581_v21  ;;  %v658_v50 = vpop.f32.mrb[3].mxu0 }
 0x304   : > { %v896_v51 = vpack.c.bf16 %v655_v47, %v653_v45  ;;  %v659_v52 = vadd.f32 %v658_v50, %v581_v21 }
 0x306   : > { %760 = vst [vmem:[%s1219_s9] sm:$0xff] %v896_v51  ;;  %v898_v53 = vpack.c.bf16 %v659_v52, %v657_v49 }
 0x308   : > { %762 = vst [vmem:[%s1219_s9 + $0xc] sm:$0xff] %v898_v53  ;;  %v662_v54 = vpop.f32.mrb[4].mxu0 }
 0x309   : > { %v663_v55 = vadd.f32 %v662_v54, %v586_v24  ;;  %v664_v56 = vpop.f32.mrb[5].mxu0 }
 0x30a   : > { %v665_v57 = vadd.f32 %v664_v56, %v586_v24  ;;  %v666_v23 = vpop.f32.mrb[6].mxu0  ;;  %774 = sbr.rel (!%p1047_p4) target bundleno = 793 (0x319), region = 44 }
 0x30b   : > { %v667_v58 = vadd.f32 %v666_v23, %v591_v36  ;;  %v668_v25 = vpop.f32.mrb[7].mxu0 }
 0x30c   : > { %v900_v59 = vpack.c.bf16 %v665_v57, %v663_v55  ;;  %v669_v60 = vadd.f32 %v668_v25, %v591_v36 }
 0x30d   : > { %v792_v62 = vld [vmem:[%s1219_s9] sm:$0xff] (%p1047_p4) }
 0x30e   : > { %764 = vst [vmem:[%s1219_s9 + $0x18] sm:$0xff] %v900_v59  ;;  %v902_v61 = vpack.c.bf16 %v669_v60, %v667_v58  ;;  %793 = vst [vmem:[%s777_s26] sm:$0xff] (%p1047_p4), %v792_v62 }
 0x30f   : > { %v794_v63 = vld [vmem:[%s1219_s9 + $0xc] sm:$0xff] (%p1047_p4) }
 0x310   : > { %766 = vst [vmem:[%s1219_s9 + $0x24] sm:$0xff] %v902_v61  ;;  %795 = vst [vmem:[%s777_s26 + $0x24] sm:$0xff] (%p1047_p4), %v794_v63 }
 0x315   : > { %v796_v0 = vld [vmem:[%s1219_s9 + $0x18] sm:$0xff] }
 0x316   : > { %797 = vst [vmem:[%s777_s26 + $0x48] sm:$0xff] %v796_v0 }
 0x317   : > { %v798_v1 = vld [vmem:[%s1219_s9 + $0x24] sm:$0xff] }
 0x318   : > { %799 = vst [vmem:[%s777_s26 + $0x6c] sm:$0xff] %v798_v1 }
 0x319 PF: > { %p12_p7 = scmp.ge.s32.totalorder %s1037_s22, 5   ;;  %s1260_s18 = smov %s976_s19 }
 0x31a   : > { %s1261_s19 = smov %s1045_s25  ;;  %s1262_s20 = smov %s1037_s22 }
 0x31b   :  { %14 = sbr.rel (!%p12_p7) target bundleno = 2 (0x2), region = 102 }

// kernel: attention_pe_forward.3
= control target key start
LH: loop header
LB: loop body
LE: loop exit
PB: predicated region body
PF: predicated region fallthrough
CT: control target
= control target key end

     0   :  { %s1192_s15 = smov 0   ;;  %s1194_s16 = smov 0   ;;  %s1454_s0 = inlined_call_operand.vmem [shape: bf16[96,256], index: 0, kind: input, shape index: {}]   ;;  %s1455_s1 = inlined_call_operand.vmem [shape: f32[32,256], index: 1, kind: input, shape index: {}]   ;;  %s1456_s2 = inlined_call_operand.vmem [shape: bf16[8,8], index: 2, kind: input, shape index: {}]   ;;  %s1457_s3 = inlined_call_operand.vmem [shape: f32[8,1], index: 3, kind: input, shape index: {}]   ;;  %s1458_s4 = inlined_call_operand.vmem [shape: f32[32,256], index: 4, kind: output, shape index: {}]  }
   0x1   :  { %s1196_s17 = smov 0  }
   0x2 LB: > { %s1034_s18 = sadd.s32 4294967295, %s1162_s17   ;;  %s1209_s19 = sadd.s32 1, %s1162_s17   ;;  %s1162_s17 = sphi %s1196_s17, %s1463_s17   ;;  %s1158_s16 = sphi %s1194_s16, %s1462_s16   ;;  %s1154_s15 = sphi %s1192_s15, %s1461_s15  }
   0x3   : > { %s18_s20 = ssub.s32 %s1162_s17, %s1209_s19  ;;  %s21_s21 = sadd.s32 1, %s1158_s16 }
   0x4   : > { %p19_p0 = scmp.eq.s32.totalorder %s18_s20, 0  ;;  %p28_p1 = scmp.ne.s32.totalorder %s1158_s16, %s1154_s15 }
   0x5   : > { %p29_p2 = scmp.eq.s32.totalorder %s1162_s17, 0  ;;  %p126_p3 = scmp.eq.s32.totalorder %s1034_s18, 1 }
   0x6   : > { %s1220_s22 = scalar_select %p19_p0, %s1158_s16, %s21_s21  }
   0x7   : > { %p1222_p4 = por %p29_p2, %p28_p1  ;;  %p1226_p5 = por %p126_p3, %p28_p1 }
   0x8   : > { %p1037_p6 = scmp.ge.s32.totalorder %s1162_s17, 2 }
   0xa   : > { %154 = sbr.rel (%p1037_p6) target bundleno = 36 (0x24), region = 24 }
  0x11   : > { %157 = sbr.rel (!%p1222_p4) target bundleno = 29 (0x1d), region = 28  ;;  %s159_s25 = sand.u32 (%p1222_p4), 1, %s1158_s16  }
  0x12   : > { %s1038_s26 = sshll.u32 (%p1222_p4), %s1162_s17, 2  ;;  %s1104_s27 = smul.u32 (%p1222_p4), 48, %s159_s25 }
  0x13   : > { %s163_s30 = scalar_lea.vmem (%p1222_p4), %s1454_s0, %s1038_s26 }
  0x14   : > { %v179_v0 = vld [vmem:[%s163_s30] sm:$0xf] (%p1222_p4)  ;;  %v181_v1 = vld [vmem:[%s163_s30 + $0x8] sm:$0xf] (%p1222_p4)  ;;  %v183_v2 = vld [vmem:[%s163_s30 + $0x10] sm:$0xf] (%p1222_p4) }
  0x15   : > { %v185_v3 = vld [vmem:[%s163_s30 + $0x18] sm:$0xf] (%p1222_p4)  ;;  %v187_v4 = vld [vmem:[%s163_s30 + $0x20] sm:$0xf] (%p1222_p4)  ;;  %s161_s5 = scalar_lea.vmem (%p1222_p4), [#allocation2], %s1104_s27 }
  0x16   : > { %180 = vst [vmem:[%s161_s5] sm:$0xf] (%p1222_p4), %v179_v0  ;;  %182 = vst [vmem:[%s161_s5 + $0x4] sm:$0xf] (%p1222_p4), %v181_v1  ;;  %v189_v5 = vld [vmem:[%s163_s30 + $0x28] sm:$0xf] (%p1222_p4) }
  0x17   : > { %184 = vst [vmem:[%s161_s5 + $0x8] sm:$0xf] (%p1222_p4), %v183_v2  ;;  %186 = vst [vmem:[%s161_s5 + $0xc] sm:$0xf] (%p1222_p4), %v185_v3  ;;  %v191_v6 = vld [vmem:[%s163_s30 + $0x30] sm:$0xf] (%p1222_p4) }
  0x18   : > { %188 = vst [vmem:[%s161_s5 + $0x10] sm:$0xf] %v187_v4  ;;  %v193_v7 = vld [vmem:[%s163_s30 + $0x38] sm:$0xf]  ;;  %190 = vst [vmem:[%s161_s5 + $0x14] sm:$0xf] %v189_v5 }
  0x19   : > { %192 = vst [vmem:[%s161_s5 + $0x18] sm:$0xf] %v191_v6  ;;  %194 = vst [vmem:[%s161_s5 + $0x1c] sm:$0xf] %v193_v7  ;;  %v195_v8 = vld [vmem:[%s163_s30 + $0x40] sm:$0xf] }
  0x1a   : > { %v197_v9 = vld [vmem:[%s163_s30 + $0x48] sm:$0xf]  ;;  %v199_v10 = vld [vmem:[%s163_s30 + $0x50] sm:$0xf]  ;;  %196 = vst [vmem:[%s161_s5 + $0x20] sm:$0xf] %v195_v8 }
  0x1b   : > { %198 = vst [vmem:[%s161_s5 + $0x24] sm:$0xf] %v197_v9  ;;  %200 = vst [vmem:[%s161_s5 + $0x28] sm:$0xf] %v199_v10  ;;  %v201_v11 = vld [vmem:[%s163_s30 + $0x58] sm:$0xf] }
  0x1c   : > { %202 = vst [vmem:[%s161_s5 + $0x2c] sm:$0xf] %v201_v11 }
  0x1d PF: > { %249 = sbr.rel (!%p1222_p4) target bundleno = 36 (0x24), region = 69  ;;  %s251_s6 = sand.u32 (%p1222_p4), 1, %s1158_s16  }
  0x1e   : > { %s1040_s7 = sshll.u32 (%p1222_p4), %s1162_s17, 3  ;;  %s1039_s8 = sshll.u32 (%p1222_p4), %s251_s6, 5 }
  0x1f   : > { %s255_s11 = scalar_lea.vmem (%p1222_p4), %s1455_s1, %s1040_s7  ;;  %s253_s12 = scalar_lea.vmem (%p1222_p4), [#allocation3], %s1039_s8 }
  0x20   : > { %v289_v12 = vld [vmem:[%s255_s11] sm:$0xff] (%p1222_p4)  ;;  %v291_v13 = vld [vmem:[%s255_s11 + $0x10] sm:$0xff] (%p1222_p4) }
  0x21   : > { %v293_v14 = vld [vmem:[%s255_s11 + $0x20] sm:$0xff] (%p1222_p4)  ;;  %290 = vst [vmem:[%s253_s12] sm:$0xff] (%p1222_p4), %v289_v12  ;;  %292 = vst [vmem:[%s253_s12 + $0x8] sm:$0xff] (%p1222_p4), %v291_v13  ;;  %v295_v15 = vld [vmem:[%s255_s11 + $0x30] sm:$0xff] (%p1222_p4) }
  0x22   : > { %294 = vst [vmem:[%s253_s12 + $0x10] sm:$0xff] (%p1222_p4), %v293_v14  ;;  %296 = vst [vmem:[%s253_s12 + $0x18] sm:$0xff] (%p1222_p4), %v295_v15 }
  0x24 PF: > { %p1041_p7 = scmp.ge.s32.totalorder %s1162_s17, 1  ;;  %p301_p8 = scmp.lt.s32.totalorder %s1162_s17, 3 }
  0x26   : > { %p302_p9 = pnand %p1041_p7, %p301_p8 }
  0x27   : > { %s308_s13 = sand.u32 (!%p302_p9), 1, %s1154_s15   ;;  %v1164_v16 = vmov (!%p302_p9), 0.0   ;;  %v588_v17 = vld [vmem:[%s1457_s3] sm:$0xff] (!%p302_p9)  ;;  %vm1165_vm0 = vmmov (!%p302_p9), 0   ;;  %v1166_v20 = vmov (!%p302_p9), 0   ;;  %vm524_vm1 = vcmask (!%p302_p9), 1040384  }
  0x28   : > { %305 = sbr.rel (%p302_p9) target bundleno = 392 (0x188), region = 107  ;;  %1080 = vmatprep.subr.bf16.mxu0 (!%p302_p9), %v1164_v16  ;;  %1086 = vmatprep.subr.bf16.mxu1 (!%p302_p9), %v1164_v16  ;;  %vm526_vm2 = vcmask (!%p302_p9), 1041408   ;;  %vm528_vm3 = vcmask (!%p302_p9), 1042432   ;;  %vm530_vm4 = vcmask (!%p302_p9), 1043456   ;;  %vm532_vm5 = vcmask (!%p302_p9), 1044480   ;;  %s1042_s27 = sshll.u32 (!%p302_p9), %s308_s13, 5 }
  0x29   : > { %s1105_s14 = smul.u32 (!%p302_p9), 48, %s308_s13  ;;  %1082 = vmatprep.mubr.msk.bf16.mxu0 (!%p302_p9), %vm1165_vm0, %v1164_v16  ;;  %1088 = vmatprep.mubr.msk.bf16.mxu1 (!%p302_p9), %vm1165_vm0, %v1164_v16  ;;  %vm534_vm6 = vcmask (!%p302_p9), 1045504   ;;  %vm536_vm7 = vcmask (!%p302_p9), 1046528   ;;  %vm629_vm8 = vcmask (!%p302_p9), 64512   ;;  %s317_s28 = scalar_lea.vmem (!%p302_p9), [#allocation3], %s1042_s27 }
  0x2a   : > { %1133 = vset.pattern.permute.xlu0 (!%p302_p9), %v1166_v20  ;;  %s342_s29 = scalar_lea.vmem (!%p302_p9), [#allocation4], %s1042_s27 }
  0x2b   : > { %s1259_s23 = scalar_lea.vmem (!%p302_p9), [#allocation2], %s1105_s14  ;;  %626 = vperm.xlu0 (!%p302_p9), %1133, %v588_v17  }
  0x2c   : > { %v1068_v18 = vld [vmem:[%s1259_s23 + $0x10] sm:$0xff] (!%p302_p9)   ;;  %v1069_v19 = vld [vmem:[%s1259_s23 + $0x18] sm:$0xff] (!%p302_p9)   ;;  %v360_v25 = vld [vmem:[%s1259_s23] sm:$0xff] (!%p302_p9)  }
  0x2d   : > { %v1263_v21 = vunpack.c.l.bf16 (!%p302_p9), %v1068_v18  ;;  %v1265_v22 = vunpack.c.h.bf16 (!%p302_p9), %v1068_v18  ;;  %v1267_v23 = vunpack.c.l.bf16 (!%p302_p9), %v1069_v19  ;;  %v1269_v24 = vunpack.c.h.bf16 (!%p302_p9), %v1069_v19  ;;  %v442_v26 = vld [vmem:[%s1259_s23 + $0x8] sm:$0xff] (!%p302_p9)  }
  0x2e   : > { %v361_v27 = vunpack.c.l.bf16 (!%p302_p9), %v360_v25  ;;  %v402_v28 = vunpack.c.h.bf16 (!%p302_p9), %v360_v25  ;;  %v1273_v29 = vunpack.c.l.bf16 (!%p302_p9), %v442_v26  ;;  %v1275_v30 = vunpack.c.h.bf16 (!%p302_p9), %v442_v26 }
  0x2f   : > { %s1049_s15 = sshll.u32 (%p1226_p5), %s1034_s18, 3 }
  0x30   : > { %v362_v31 = vmul.f32 %v1263_v21, %v361_v27  ;;  %v370_v32 = vmul.f32 %v1265_v22, %v361_v27  ;;  %v378_v33 = vmul.f32 %v1267_v23, %v361_v27  ;;  %v386_v34 = vmul.f32 %v1269_v24, %v361_v27  ;;  %s915_s6 = scalar_lea.vmem (%p1226_p5), %s1458_s4, %s1049_s15 }
  0x31   : > { %v403_v35 = vmul.f32 %v1263_v21, %v402_v28  ;;  %v411_v36 = vmul.f32 %v1265_v22, %v402_v28  ;;  %v419_v37 = vmul.f32 %v1267_v23, %v402_v28  ;;  %v427_v38 = vmul.f32 %v1269_v24, %v402_v28 }
  0x32   : > { %v363_v39 = vrot.slane %v362_v31, 4  ;;  %v371_v40 = vrot.slane %v370_v32, 4  ;;  %v379_v41 = vrot.slane %v378_v33, 4  ;;  %v387_v42 = vrot.slane %v386_v34, 4 }
  0x33   : > { %v404_v43 = vrot.slane %v403_v35, 4  ;;  %v412_v44 = vrot.slane %v411_v36, 4  ;;  %v420_v45 = vrot.slane %v419_v37, 4  ;;  %v428_v46 = vrot.slane %v427_v38, 4 }
  0x34   : > { %v364_v47 = vadd.f32 %v363_v39, %v362_v31  ;;  %v372_v48 = vadd.f32 %v371_v40, %v370_v32  ;;  %v380_v49 = vadd.f32 %v379_v41, %v378_v33  ;;  %v388_v50 = vadd.f32 %v387_v42, %v386_v34 }
  0x35   : > { %v405_v51 = vadd.f32 %v404_v43, %v403_v35  ;;  %v413_v52 = vadd.f32 %v412_v44, %v411_v36  ;;  %v421_v53 = vadd.f32 %v420_v45, %v419_v37  ;;  %v429_v54 = vadd.f32 %v428_v46, %v427_v38 }
  0x36   : > { %v365_v55 = vrot.slane %v364_v47, 2  ;;  %v373_v56 = vrot.slane %v372_v48, 2  ;;  %v381_v57 = vrot.slane %v380_v49, 2  ;;  %v389_v58 = vrot.slane %v388_v50, 2 }
  0x37   : > { %v406_v59 = vrot.slane %v405_v51, 2  ;;  %v414_v60 = vrot.slane %v413_v52, 2  ;;  %v422_v61 = vrot.slane %v421_v53, 2  ;;  %v430_v62 = vrot.slane %v429_v54, 2 }
  0x38   : > { %v366_v63 = vadd.f32 %v365_v55, %v364_v47  ;;  %v374_v0 = vadd.f32 %v373_v56, %v372_v48  ;;  %v382_v1 = vadd.f32 %v381_v57, %v380_v49  ;;  %v390_v2 = vadd.f32 %v389_v58, %v388_v50 }
  0x39   : > { %v407_v3 = vadd.f32 %v406_v59, %v405_v51  ;;  %v415_v4 = vadd.f32 %v414_v60, %v413_v52  ;;  %v423_v5 = vadd.f32 %v422_v61, %v421_v53  ;;  %v431_v6 = vadd.f32 %v430_v62, %v429_v54 }
  0x3a   : > { %v367_v7 = vrot.slane %v366_v63, 1  ;;  %v375_v8 = vrot.slane %v374_v0, 1  ;;  %v383_v9 = vrot.slane %v382_v1, 1  ;;  %v391_v10 = vrot.slane %v390_v2, 1 }
  0x3b   : > { %v408_v11 = vrot.slane %v407_v3, 1  ;;  %v416_v12 = vrot.slane %v415_v4, 1  ;;  %v424_v13 = vrot.slane %v423_v5, 1  ;;  %v432_v14 = vrot.slane %v431_v6, 1 }
  0x3c   : > { %v368_v15 = vadd.f32 %v367_v7, %v366_v63  ;;  %v376_v17 = vadd.f32 %v375_v8, %v374_v0  ;;  %v384_v18 = vadd.f32 %v383_v9, %v382_v1  ;;  %v392_v19 = vadd.f32 %v391_v10, %v390_v2 }
  0x3d   : > { %v409_v20 = vadd.f32 %v408_v11, %v407_v3  ;;  %v417_v25 = vadd.f32 %v416_v12, %v415_v4  ;;  %v425_v26 = vadd.f32 %v424_v13, %v423_v5  ;;  %v433_v27 = vadd.f32 %v432_v14, %v431_v6 }
  0x3e   : > { %v1285_v28 = vmul.f32 0.35355338, %v368_v15  ;;  %v1287_v31 = vmul.f32 0.35355338, %v376_v17  ;;  %v1289_v32 = vmul.f32 0.35355338, %v384_v18  ;;  %v444_v33 = vmul.f32 %v1263_v21, %v1273_v29 }
  0x3f   : > { %v1293_v34 = vmul.f32 0.35355338, %v392_v19  ;;  %v1295_v35 = vmul.f32 0.35355338, %v409_v20  ;;  %v1297_v36 = vmul.f32 0.35355338, %v417_v25  ;;  %v452_v37 = vmul.f32 %v1265_v22, %v1273_v29 }
  0x40   : > { %v394_v38 = vmax.f32 %v1285_v28, %v1287_v31  ;;  %v1303_v39 = vmul.f32 0.35355338, %v425_v26  ;;  %v1305_v40 = vmul.f32 0.35355338, %v433_v27  ;;  %v445_v41 = vrot.slane %v444_v33, 4 }
  0x41   : > { %v435_v42 = vmax.f32 %v1295_v35, %v1297_v36  ;;  %v453_v43 = vrot.slane %v452_v37, 4  ;;  %v460_v44 = vmul.f32 %v1267_v23, %v1273_v29  ;;  %v468_v45 = vmul.f32 %v1269_v24, %v1273_v29 }
  0x42   : > { %v395_v46 = vmax.f32 %v394_v38, %v1289_v32  ;;  %v446_v47 = vadd.f32 %v445_v41, %v444_v33  ;;  %v485_v48 = vmul.f32 %v1263_v21, %v1275_v30  ;;  %v493_v49 = vmul.f32 %v1265_v22, %v1275_v30 }
  0x43   : > { %v436_v50 = vmax.f32 %v435_v42, %v1303_v39  ;;  %v454_v51 = vadd.f32 %v453_v43, %v452_v37  ;;  %v461_v52 = vrot.slane %v460_v44, 4  ;;  %v469_v53 = vrot.slane %v468_v45, 4 }
  0x44   : > { %v1320_v54 = vmax.f32 %v395_v46, %v1293_v34  ;;  %v447_v55 = vrot.slane %v446_v47, 2  ;;  %v486_v56 = vrot.slane %v485_v48, 4  ;;  %v494_v29 = vrot.slane %v493_v49, 4 }
  0x45   : > { %v1323_v57 = vmax.f32 %v436_v50, %v1305_v40  ;;  %v455_v58 = vrot.slane %v454_v51, 2  ;;  %v462_v59 = vadd.f32 %v461_v52, %v460_v44  ;;  %v470_v21 = vadd.f32 %v469_v53, %v468_v45 }
  0x46   : > { %v397_v22 = vsub.f32 %v1285_v28, %v1320_v54  ;;  %v398_v60 = vsub.f32 %v1287_v31, %v1320_v54  ;;  %v399_v61 = vsub.f32 %v1289_v32, %v1320_v54  ;;  %v400_v62 = vsub.f32 %v1293_v34, %v1320_v54 }
  0x47   : > { %v438_v63 = vsub.f32 %v1295_v35, %v1323_v57  ;;  %v448_v0 = vadd.f32 %v447_v55, %v446_v47  ;;  %v456_v1 = vadd.f32 %v455_v58, %v454_v51  ;;  %v463_v2 = vrot.slane %v462_v59, 2 }
  0x48   : > { %v471_v3 = vrot.slane %v470_v21, 2  ;;  %v487_v4 = vadd.f32 %v486_v56, %v485_v48  ;;  %v495_v5 = vadd.f32 %v494_v29, %v493_v49  ;;  %v501_v6 = vmul.f32 %v1267_v23, %v1275_v30 }
  0x49   : > { %v509_v7 = vmul.f32 %v1269_v24, %v1275_v30  ;;  %v449_v8 = vrot.slane %v448_v0, 1  ;;  %v457_v9 = vrot.slane %v456_v1, 1  ;;  %v464_v10 = vadd.f32 %v463_v2, %v462_v59 }
  0x4a   : > { %v472_v11 = vadd.f32 %v471_v3, %v470_v21  ;;  %v488_v12 = vrot.slane %v487_v4, 2  ;;  %v496_v13 = vrot.slane %v495_v5, 2  ;;  %v502_v14 = vrot.slane %v501_v6, 4 }
  0x4b   : > { %v510_v15 = vrot.slane %v509_v7, 4  ;;  %v450_v17 = vadd.f32 %v449_v8, %v448_v0  ;;  %v458_v18 = vadd.f32 %v457_v9, %v456_v1  ;;  %v465_v19 = vrot.slane %v464_v10, 1 }
  0x4c   : > { %v473_v20 = vrot.slane %v472_v11, 1  ;;  %v489_v25 = vadd.f32 %v488_v12, %v487_v4  ;;  %v497_v23 = vadd.f32 %v496_v13, %v495_v5  ;;  %v503_v26 = vadd.f32 %v502_v14, %v501_v6 }
  0x4d   : > { %v511_v27 = vadd.f32 %v510_v15, %v509_v7  ;;  %v451_v24 = vmul.f32 0.35355338, %v450_v17  ;;  %v459_v30 = vmul.f32 0.35355338, %v458_v18  ;;  %v466_v28 = vadd.f32 %v465_v19, %v464_v10 }
  0x4e   : > { %v474_v31 = vadd.f32 %v473_v20, %v472_v11  ;;  %v490_v32 = vrot.slane %v489_v25, 1  ;;  %v498_v33 = vrot.slane %v497_v23, 1  ;;  %v504_v34 = vrot.slane %v503_v26, 2 }
  0x4f   : > { %v512_v35 = vrot.slane %v511_v27, 2  ;;  %v467_v37 = vmul.f32 0.35355338, %v466_v28  ;;  %v476_v41 = vmax.f32 %v451_v24, %v459_v30  ;;  %v525_v42 = vsel %vm524_vm1, %v397_v22, %v398_v60 }
  0x50   : > { %v475_v38 = vmul.f32 0.35355338, %v474_v31  ;;  %v491_v43 = vadd.f32 %v490_v32, %v489_v25  ;;  %v499_v44 = vadd.f32 %v498_v33, %v497_v23  ;;  %v505_v45 = vadd.f32 %v504_v34, %v503_v26 }
  0x51   : > { %v513_v46 = vadd.f32 %v512_v35, %v511_v27  ;;  %v439_v47 = vsub.f32 %v1297_v36, %v1323_v57  ;;  %v477_v48 = vmax.f32 %v476_v41, %v467_v37  ;;  %v527_v49 = vsel %vm526_vm2, %v525_v42, %v399_v61 }
  0x52   : > { %v492_v50 = vmul.f32 0.35355338, %v491_v43  ;;  %v500_v51 = vmul.f32 0.35355338, %v499_v44  ;;  %v506_v52 = vrot.slane %v505_v45, 1  ;;  %v440_v54 = vsub.f32 %v1303_v39, %v1323_v57 }
  0x53   : > { %v514_v53 = vrot.slane %v513_v46, 1  ;;  %v441_v55 = vsub.f32 %v1305_v40, %v1323_v57  ;;  %v478_v56 = vmax.f32 %v477_v48, %v475_v38  ;;  %v529_v29 = vsel %vm528_vm3, %v527_v49, %v400_v62 }
  0x54   : > { %v507_v58 = vadd.f32 %v506_v52, %v505_v45  ;;  %v517_v36 = vmax.f32 %v492_v50, %v500_v51  ;;  %v531_v21 = vsel %vm530_vm4, %v529_v29, %v438_v63 }
  0x55   : > { %v515_v59 = vadd.f32 %v514_v53, %v513_v46  ;;  %v479_v22 = vsub.f32 %v451_v24, %v478_v56  ;;  %v480_v60 = vsub.f32 %v459_v30, %v478_v56  ;;  %v481_v61 = vsub.f32 %v467_v37, %v478_v56 }
  0x56   : > { %v508_v0 = vmul.f32 0.35355338, %v507_v58  ;;  %v533_v2 = vsel %vm532_vm5, %v531_v21, %v439_v47  ;;  %v482_v39 = vsub.f32 %v475_v38, %v478_v56  ;;  %v590_v58 = vlaneseq }
  0x57   : > { %v516_v1 = vmul.f32 0.35355338, %v515_v59  ;;  %v535_v3 = vsel %vm534_vm6, %v533_v2, %v440_v54  ;;  %v538_v40 = vsel %vm524_vm1, %v479_v22, %v480_v60  ;;  %v1070_v59 = vld [vmem:[%s1259_s23 + $0x20] sm:$0xff]  }
  0x58   : > { %v518_v57 = vmax.f32 %v517_v36, %v508_v0  ;;  %v537_v62 = vsel %vm536_vm7, %v535_v3, %v441_v55  ;;  %v539_v4 = vsel %vm526_vm2, %v538_v40, %v481_v61  ;;  %v1071_v36 = vld [vmem:[%s1259_s23 + $0x28] sm:$0xff]   ;;  %v1376_v21 = vshrl.u32 %v590_v58, 7 }
  0x59   : > { %v545_v5 = vmul.f32 1.442695, %v537_v62  ;;  %v540_v6 = vsel %vm528_vm3, %v539_v4, %v482_v39  ;;  %v1378_v22 = vunpack.c.l.bf16 %v1070_v59  ;;  %v1063_v60 = vunpack.c.h.bf16 %v1070_v59 }
  0x5a   : > { %v519_v63 = vmax.f32 %v518_v57, %v516_v1  ;;  %v1380_v61 = vunpack.c.l.bf16 %v1071_v36  ;;  %v601_v2 = vsub.s32 1, %v1376_v21  ;;  %v610_v39 = vsub.s32 2, %v1376_v21 }
  0x5b   : > { %1134 = vpow2.f32 %v545_v5  ;;  %v619_v3 = vsub.s32 3, %v1376_v21  ;;  %v681_v57 = vsub.s32 4, %v1376_v21  ;;  %v689_v62 = vsub.s32 5, %v1376_v21 }
  0x5c   : > { %v520_v7 = vsub.f32 %v492_v50, %v519_v63  ;;  %v521_v8 = vsub.f32 %v500_v51, %v519_v63  ;;  %v522_v9 = vsub.f32 %v508_v0, %v519_v63  ;;  %v523_v10 = vsub.f32 %v516_v1, %v519_v63 }
  0x5d   : > { %v1382_v0 = vunpack.c.h.bf16 %v1071_v36  ;;  %v592_v1 = vsub.s32 0, %v1376_v21  ;;  %v698_v4 = vsub.s32 6, %v1376_v21  ;;  %v707_v5 = vsub.s32 7, %v1376_v21 }
  0x5e   : > { %v541_v11 = vsel %vm530_vm4, %v540_v6, %v520_v7 }
  0x5f   : > { %v542_v12 = vsel %vm532_vm5, %v541_v11, %v521_v8 }
  0x60   : > { %v543_v13 = vsel %vm534_vm6, %v542_v12, %v522_v9 }
  0x61   : > { %v544_v14 = vsel %vm536_vm7, %v543_v13, %v523_v10 }
  0x62   : > { %v547_v15 = vmul.f32 1.442695, %v544_v14 }
  0x64   : > { %1136 = vpow2.f32 %v547_v15 }
  0x65   : > { %v1359_v17 = vpop.eup %1134 }
  0x66   : > { %v549_v18 = vsel %vm530_vm4, %v1359_v17, 0.0  ;;  %v557_v19 = vrot.slane %v1359_v17, 4 }
  0x67   : > { %v550_v20 = vrot.slane %v549_v18, 4 }
  0x68   : > { %v559_v25 = vsel %vm530_vm4, %v557_v19, 0.0 }
  0x69   : > { %v551_v23 = vadd.f32 %v550_v20, %v549_v18  ;;  %v560_v26 = vrot.slane %v559_v25, 4 }
  0x6b   : > { %v552_v27 = vrot.slane %v551_v23, 2  ;;  %v561_v24 = vadd.f32 %v560_v26, %v559_v25 }
  0x6d   : > { %v553_v30 = vadd.f32 %v552_v27, %v551_v23  ;;  %v562_v28 = vrot.slane %v561_v24, 2 }
  0x6e   : > { %v1365_v31 = vpop.eup %1136 }
  0x6f   : > { %v563_v32 = vadd.f32 %v562_v28, %v561_v24  ;;  %v566_v33 = vsel %vm530_vm4, %v1365_v31, 0.0  ;;  %v574_v34 = vrot.slane %v1365_v31, 4  ;;  %v554_v37 = vrot.slane %v553_v30, 1 }
  0x70   : > { %v567_v35 = vrot.slane %v566_v33, 4 }
  0x71   : > { %v564_v38 = vrot.slane %v563_v32, 1  ;;  %v576_v41 = vsel %vm530_vm4, %v574_v34, 0.0  ;;  %v555_v46 = vadd.f32 %v554_v37, %v553_v30 }
  0x72   : > { %v568_v42 = vadd.f32 %v567_v35, %v566_v33  ;;  %v577_v43 = vrot.slane %v576_v41, 4 }
  0x73   : > { %v565_v47 = vadd.f32 %v564_v38, %v563_v32 }
  0x74   : > { %v569_v44 = vrot.slane %v568_v42, 2  ;;  %v578_v45 = vadd.f32 %v577_v43, %v576_v41 }
  0x75   : > { %v583_v52 = vsel %vm524_vm1, %v555_v46, %v565_v47 }
  0x76   : > { %v570_v48 = vadd.f32 %v569_v44, %v568_v42  ;;  %v579_v49 = vrot.slane %v578_v45, 2 }
  0x78   : > { %v571_v50 = vrot.slane %v570_v48, 1  ;;  %v580_v51 = vadd.f32 %v579_v49, %v578_v45 }
  0x7a   : > { %v572_v53 = vadd.f32 %v571_v50, %v570_v48  ;;  %v581_v54 = vrot.slane %v580_v51, 1 }
  0x7c   : > { %v582_v55 = vadd.f32 %v581_v54, %v580_v51  ;;  %v584_v56 = vsel %vm526_vm2, %v583_v52, %v572_v53 }
  0x7e   : > { %v585_v29 = vsel %vm528_vm3, %v584_v56, %v582_v55 }
  0x7f   : > { %1138 = vrcp.f32 %v585_v29 }
  0x89   : > { %v1139_v40 = vpop.eup %1138 }
  0x8a   : > { %v589_v63 = vmul.f32 %v1139_v40, %v1359_v17  ;;  %v596_v6 = vrot.slane %v1139_v40, 7  ;;  %v605_v7 = vrot.slane %v1139_v40, 6  ;;  %v614_v8 = vrot.slane %v1139_v40, 5 }
  0x8b   : > { %v684_v9 = vrot.slane %v1139_v40, 4  ;;  %v693_v10 = vrot.slane %v1139_v40, 3  ;;  %v702_v11 = vrot.slane %v1139_v40, 2  ;;  %v764_v12 = vrot.slane %v1139_v40, 1 }
  0x8c   : > { %v593_v13 = vrot.slane %v589_v63, %v592_v1  ;;  %v598_v14 = vmul.f32 %v1359_v17, %v596_v6  ;;  %v607_v15 = vmul.f32 %v1359_v17, %v605_v7  ;;  %v616_v18 = vmul.f32 %v1359_v17, %v614_v8 }
  0x8d   : > { %v839_v19 = vmul.f32 %v1365_v31, %v605_v7  ;;  %v846_v20 = vmul.f32 %v1365_v31, %v614_v8  ;;  %v686_v25 = vmul.f32 %v1359_v17, %v684_v9  ;;  %v695_v23 = vmul.f32 %v1359_v17, %v693_v10 }
  0x8e   : > { %v594_v26 = vmul.f32 %v1378_v22, %v593_v13  ;;  %v602_v27 = vrot.slane %v598_v14, %v601_v2  ;;  %v611_v24 = vrot.slane %v607_v15, %v610_v39  ;;  %v620_v30 = vrot.slane %v616_v18, %v619_v3 }
  0x8f   : > { %v682_v28 = vrot.slane %v616_v18, %v681_v57  ;;  %v690_v32 = vrot.slane %v686_v25, %v689_v62  ;;  %v699_v33 = vrot.slane %v695_v23, %v698_v4  ;;  %v704_v34 = vmul.f32 %v1359_v17, %v702_v11 }
  0x90   : > { %v603_v35 = vmul.f32 %v1063_v60, %v602_v27  ;;  %v612_v37 = vmul.f32 %v1380_v61, %v611_v24  ;;  %v621_v38 = vmul.f32 %v1382_v0, %v620_v30  ;;  %v758_v41 = vmul.f32 %v1365_v31, %v702_v11 }
  0x91   : > { %v683_v42 = vmul.f32 %v1378_v22, %v682_v28  ;;  %v691_v43 = vmul.f32 %v1063_v60, %v690_v32  ;;  %v700_v44 = vmul.f32 %v1380_v61, %v699_v33  ;;  %v708_v45 = vrot.slane %v704_v34, %v707_v5 }
  0x92   : > { %v604_v46 = vadd.f32 %v603_v35, %v594_v26  ;;  %v762_v47 = vrot.slane %v758_v41, %v592_v1  ;;  %v766_v48 = vmul.f32 %v1365_v31, %v764_v12  ;;  %v773_v49 = vmul.f32 %v1139_v40, %v1365_v31  ;;  %v755_v26 = vld [vmem:[%s317_s28 + $0x8] sm:$0xff] }
  0x93   : > { %v692_v17 = vadd.f32 %v691_v43, %v683_v42  ;;  %v709_v50 = vmul.f32 %v1382_v0, %v708_v45  ;;  %v780_v51 = vmul.f32 %v1365_v31, %v596_v6  ;;  %v843_v52 = vrot.slane %v839_v19, %v689_v62  ;;  %v904_v43 = vld [vmem:[%s317_s28 + $0x18] sm:$0xff] }
  0x94   : > { %v613_v53 = vadd.f32 %v612_v37, %v604_v46  ;;  %v763_v54 = vmul.f32 %v1378_v22, %v762_v47  ;;  %v770_v55 = vrot.slane %v766_v48, %v601_v2  ;;  %v777_v56 = vrot.slane %v773_v49, %v610_v39 }
  0x95   : > { %v701_v29 = vadd.f32 %v700_v44, %v692_v17  ;;  %v784_v58 = vrot.slane %v780_v51, %v619_v3  ;;  %v837_v59 = vrot.slane %v780_v51, %v681_v57  ;;  %v844_v36 = vmul.f32 %v1063_v60, %v843_v52 }
  0x96   : > { %v622_v21 = vadd.f32 %v621_v38, %v613_v53  ;;  %v771_v1 = vmul.f32 %v1063_v60, %v770_v55  ;;  %v778_v63 = vmul.f32 %v1380_v61, %v777_v56  ;;  %v850_v40 = vrot.slane %v846_v20, %v698_v4  ;;  %v676_v20 = vld [vmem:[%s317_s28] sm:$0xff]  ;;  %v831_v38 = vld [vmem:[%s317_s28 + $0x10] sm:$0xff] }
  0x97   : > { %v710_v7 = vadd.f32 %v709_v50, %v701_v29  ;;  %v838_v8 = vmul.f32 %v1378_v22, %v837_v59  ;;  %v853_v6 = vmul.f32 %v1365_v31, %v684_v9  ;;  %v785_v11 = vmul.f32 %v1382_v0, %v784_v58  ;;  %v587_v22 = vld [vmem:[%s1456_s2] sm:$0xf] }
  0x98   : > { %v623_v62 = vpack.c.bf16 %v622_v21, %v622_v21  ;;  %v772_v10 = vadd.f32 %v771_v1, %v763_v54  ;;  %v851_v2 = vmul.f32 %v1380_v61, %v850_v40 }
  0x99   : > { %v711_v39 = vpack.c.bf16 %v710_v7, %v710_v7  ;;  %v845_v3 = vadd.f32 %v844_v36, %v838_v8  ;;  %v857_v57 = vrot.slane %v853_v6, %v707_v5 }
  0x9a   : > { %v634_v12 = vsel %vm530_vm4, %v623_v62, 0  ;;  %v779_v60 = vadd.f32 %v778_v63, %v772_v10 }
  0x9b   : > { %1081 = vmatpush3.bf16.msra.mxu0 %v634_v12  ;;  %v713_v4 = vsel %vm530_vm4, %v711_v39, 0  ;;  %v852_v31 = vadd.f32 %v851_v2, %v845_v3  ;;  %v858_v9 = vmul.f32 %v1382_v0, %v857_v57 }
  0x9c   : > { %1087 = vmatpush3.bf16.msra.mxu1 %v713_v4  ;;  %1092 = vmatprep.subr.bf16.mxu0 %v1164_v16  ;;  %v786_v61 = vadd.f32 %v785_v11, %v779_v60 }
  0x9d   : > { %1098 = vmatprep.subr.bf16.mxu1 %v1164_v16  ;;  %v859_v5 = vadd.f32 %v858_v9, %v852_v31 }
  0x9e   : > { %1083 = vmatmul.mubr.msk.bf16.vlgmr.msra.gmra.mrb[0].mxu0 %vm629_vm8, %v587_v22  ;;  %v787_v13 = vpack.c.bf16 %v786_v61, %v786_v61 }
  0x9f   : > { %1089 = vmatmul.mubr.msk.bf16.vlgmr.msra.gmra.mrb[0].mxu1 %vm629_vm8, %v587_v22  ;;  %v860_v14 = vpack.c.bf16 %v859_v5, %v859_v5  ;;  %1094 = vmatprep.mubr.msk.bf16.mxu0 %vm1165_vm0, %v1164_v16 }
  0xa0   : > { %v789_v15 = vsel %vm530_vm4, %v787_v13, 0  ;;  %1100 = vmatprep.mubr.msk.bf16.mxu1 %vm1165_vm0, %v1164_v16 }
  0xa1   : > { %1093 = vmatpush3.bf16.msra.mxu0 %v789_v15  ;;  %v862_v0 = vsel %vm530_vm4, %v860_v14, 0 }
  0xa2   : > { %1099 = vmatpush3.bf16.msra.mxu1 %v862_v0 }
  0xa6   : > { %1095 = vmatmul.mubr.msk.bf16.vlgmr.msra.gmra.mrb[4].mxu0 %vm629_vm8, %v587_v22 }
  0xa7   : > { %1101 = vmatmul.mubr.msk.bf16.vlgmr.msra.gmra.mrb[4].mxu1 %vm629_vm8, %v587_v22 }
  0xaa   : > { %v627_v18 = vpop.permute.xlu0 %626 }
 0x171   : > { %v670_v19 = vpop.f32.mrb[0].mxu0 }
 0x172   : > { %v749_v25 = vpop.f32.mrb[0].mxu1  ;;  %v671_v23 = vadd.f32 %v670_v19, %v627_v18  ;;  %v1084_v27 = vpop.f32.mrb[1].mxu0 }
 0x173   : > { %v750_v24 = vadd.f32 %v749_v25, %v627_v18  ;;  %v1090_v16 = vpop.f32.mrb[1].mxu1  ;;  %v673_v30 = vpop.f32.mrb[2].mxu0 }
 0x174   : > { %v677_v28 = vadd.f32 %v676_v20, %v671_v23  ;;  %v752_v32 = vpop.f32.mrb[2].mxu1  ;;  %v1085_v33 = vpop.f32.mrb[3].mxu0 }
 0x175   : > { %v756_v34 = vadd.f32 %v755_v26, %v750_v24  ;;  %v1091_v35 = vpop.f32.mrb[3].mxu1 }
 0x176   : > { %678 = vst [vmem:[%s342_s29] sm:$0xff] %v677_v28 }
 0x177   : > { %757 = vst [vmem:[%s342_s29 + $0x8] sm:$0xff] %v756_v34 }
 0x179   : > { %v825_v37 = vpop.f32.mrb[4].mxu0  ;;  %913 = sbr.rel (!%p1226_p5) target bundleno = 392 (0x188), region = 119 }
 0x17a   : > { %v826_v41 = vadd.f32 %v825_v37, %v627_v18  ;;  %v898_v42 = vpop.f32.mrb[4].mxu1  ;;  %v1096_v44 = vpop.f32.mrb[5].mxu0 }
 0x17b   : > { %v899_v45 = vadd.f32 %v898_v42, %v627_v18  ;;  %v1102_v46 = vpop.f32.mrb[5].mxu1  ;;  %v828_v47 = vpop.f32.mrb[6].mxu0 }
 0x17c   : > { %v832_v48 = vadd.f32 %v831_v38, %v826_v41  ;;  %v901_v49 = vpop.f32.mrb[6].mxu1  ;;  %v1097_v17 = vpop.f32.mrb[7].mxu0 }
 0x17d   : > { %v905_v50 = vadd.f32 %v904_v43, %v899_v45  ;;  %v1103_v51 = vpop.f32.mrb[7].mxu1  ;;  %v949_v52 = vld [vmem:[%s342_s29] sm:$0xff] (%p1226_p5) }
 0x17e   : > { %833 = vst [vmem:[%s342_s29 + $0x10] sm:$0xff] %v832_v48  ;;  %v951_v53 = vld [vmem:[%s342_s29 + $0x8] sm:$0xff] (%p1226_p5)  ;;  %950 = vst [vmem:[%s915_s6] sm:$0xff] (%p1226_p5), %v949_v52 }
 0x17f   : > { %906 = vst [vmem:[%s342_s29 + $0x18] sm:$0xff] %v905_v50  ;;  %952 = vst [vmem:[%s915_s6 + $0x10] sm:$0xff] (%p1226_p5), %v951_v53 }
 0x185   : > { %v953_v54 = vld [vmem:[%s342_s29 + $0x10] sm:$0xff] }
 0x186   : > { %v955_v55 = vld [vmem:[%s342_s29 + $0x18] sm:$0xff]  ;;  %954 = vst [vmem:[%s915_s6 + $0x20] sm:$0xff] %v953_v54 }
 0x187   : > { %956 = vst [vmem:[%s915_s6 + $0x30] sm:$0xff] %v955_v55 }
 0x188 PF: > { %p11_p10 = scmp.ge.s32.totalorder %s1209_s19, 4   ;;  %s1461_s15 = smov %s1158_s16 }
 0x189   : > { %s1462_s16 = smov %s1220_s22  ;;  %s1463_s17 = smov %s1209_s19 }
 0x18a   :  { %13 = sbr.rel (!%p11_p10) target bundleno = 2 (0x2), region = 196 }

</bundles_post_ra>
